<compile_context>
chip_gen: v6e
topology: v6e:2x2x1
jax: 0.10.0
libtpu: 0.0.40
codegen_flags: <defaults>
</compile_context>

<pallas_src>
import jax
import jax.numpy as jnp
from jax import lax
from jax.experimental import pallas as pl
from jax.experimental.pallas import tpu as pltpu

# ----------------------- synthetic "configs" (small) -----------------------
SEQ_LEN = 32          # configs.seq_len
PRED_LEN = 8          # configs.pred_len
D_MODEL = 32          # configs.d_model
D_FF = 32             # configs.d_ff  (== d_keys of ReprogrammingLayer)
N_HEADS = 4           # configs.n_heads
PATCH_LEN = 16        # configs.patch_len
STRIDE = 8            # configs.stride
D_LLM = 64            # stands in for 4096
VOCAB = 128           # stands in for llama vocab_size
NUM_TOKENS = 64       # stands in for 1000
PATCH_NUMS = (SEQ_LEN - PATCH_LEN) // STRIDE + 2       # 4
HEAD_NF = D_FF * PATCH_NUMS                            # 128
HD = N_HEADS * D_FF                                    # 128 (heads concat)
HS = N_HEADS * NUM_TOKENS                              # 256 (heads x tokens)
QW = PATCH_NUMS * HD                                   # 512
EPS = 1e-5


# =========================== fused Pallas kernel ===========================

def _fused_forecast_kernel(x_ref, wq_ref, bq_ref, kt_ref, vaug_ref,
                           who_ref, bh_ref, o_ref):
    """One block of (batch*variate) rows per grid step.

    x_ref    : (R, T)            raw series rows, time on lanes
    wq_ref   : (T, PN*HD) bf16   pad/unfold ∘ patch-embed ∘ Q-proj, all patches
    bq_ref   : (1, PN*HD)        fused Q bias (tiled per patch)
    kt_ref   : (HD, H*S) bf16    block-diagonal K^T for all heads
    vaug_ref : (H*S, 2*HD)       [block-diag V | per-head group-sum ones]
    who_ref  : (PN, HD, PRED)    out_proj[:d_ff] ∘ FlattenHead, per patch
    bh_ref   : (1, PRED)         fused head bias
    o_ref    : (R, PRED)
    """
    x = x_ref[...]                                        # (R, T) f32

    # ---- Normalize('norm') over time (lane axis); dropout = identity ----
    m = jnp.mean(x, axis=-1, keepdims=True)               # (R, 1)
    xc = x - m
    var = jnp.mean(xc * xc, axis=-1, keepdims=True)
    inv_std = lax.rsqrt(var + EPS)                        # EUP
    std = (var + EPS) * inv_std                           # == sqrt(var + eps)
    xn = (xc * inv_std).astype(jnp.bfloat16)              # (R, T)

    # ---- all patches x all heads queries in ONE lane-dense matmul ----
    q_all = jnp.dot(xn, wq_ref[...],
                    preferred_element_type=jnp.float32) + bq_ref[...]  # (R, 512)

    scale = 1.0 / jnp.sqrt(jnp.float32(D_FF))
    acc = None
    for p in range(PATCH_NUMS):                           # unrolled, 4 iters
        qp = q_all[:, p * HD:(p + 1) * HD].astype(jnp.bfloat16)        # (R, 128)

        # scores for all 4 heads at once (block-diagonal K^T)
        sc = jnp.dot(qp, kt_ref[...],
                     preferred_element_type=jnp.float32) * scale       # (R, 256)
        # row-wide max is a per-row constant -> exact per 64-lane head group
        sc = sc - jnp.max(sc, axis=-1, keepdims=True)
        e = jnp.exp(sc)                                                 # (R, 256)

        # [ sum_s e*V | sum_s e ] in one matmul; per-head softmax = num/den
        r = jnp.dot(e, vaug_ref[...],
                    preferred_element_type=jnp.float32)                # (R, 256)
        num = r[:, :HD]                                                 # (R, 128)
        den = jnp.maximum(r[:, HD:], 1e-30)                             # (R, 128)
        attn = num * pl.reciprocal(den, approx=True)                    # (R, 128)

        # out_proj[:d_ff] ∘ FlattenHead already folded into who_ref[p]
        contrib = jnp.dot(attn, who_ref[p],
                          preferred_element_type=jnp.float32)           # (R, 8)
        acc = contrib if acc is None else acc + contrib

    y = acc + bh_ref[...]                                  # FlattenHead bias
    # ---- Normalize('denorm') ----
    o_ref[...] = y * std + m


def fused_forecast(x2, p, num_steps):
    """x2: (B*N, T) rows -> (B*N, PRED_LEN). One pallas_call, <=2 fat steps."""
    R, T = x2.shape
    assert R % num_steps == 0
    rb = R // num_steps
    return pl.pallas_call(
        _fused_forecast_kernel,
        out_shape=jax.ShapeDtypeStruct((R, PRED_LEN), jnp.float32),
        grid=(num_steps,),
        in_specs=[
            pl.BlockSpec((rb, T), lambda i: (i, 0)),
            pl.BlockSpec((SEQ_LEN, QW), lambda i: (0, 0)),
            pl.BlockSpec((1, QW), lambda i: (0, 0)),
            pl.BlockSpec((HD, HS), lambda i: (0, 0)),
            pl.BlockSpec((HS, 2 * HD), lambda i: (0, 0)),
            pl.BlockSpec((PATCH_NUMS, HD, PRED_LEN), lambda i: (0, 0, 0)),
            pl.BlockSpec((1, PRED_LEN), lambda i: (0, 0)),
        ],
        out_specs=pl.BlockSpec((rb, PRED_LEN), lambda i: (i, 0)),
        compiler_params=pltpu.CompilerParams(
            dimension_semantics=("parallel",)),            # both TCs on v7x
    )(x2, p["wq_big"], p["bq_big"], p["kt_blk"], p["v_aug"],
      p["who"], p["b_fused"])


# =========================== params & folding ===========================

def init_params(key):
    ks = jax.random.split(key, 8)

    def lin_init(k, fan_in, fan_out):
        kw, kb = jax.random.split(k)
        bound = 1.0 / jnp.sqrt(jnp.float32(fan_in))
        w = jax.random.uniform(kw, (fan_in, fan_out), jnp.float32, -bound, bound)
        b = jax.random.uniform(kb, (fan_out,), jnp.float32, -bound, bound)
        return w, b

    dk = D_FF  # d_keys = configs.d_ff (passed explicitly in the PyTorch ctor)
    return {
        "word_embeddings": 0.02 * jax.random.normal(ks[0], (VOCAB, D_LLM), jnp.float32),
        "mapping": lin_init(ks[1], VOCAB, NUM_TOKENS),
        "patch_value": lin_init(ks[2], PATCH_LEN, D_MODEL),
        "q_proj": lin_init(ks[3], D_MODEL, dk * N_HEADS),
        "k_proj": lin_init(ks[4], D_LLM, dk * N_HEADS),
        "v_proj": lin_init(ks[5], D_LLM, dk * N_HEADS),
        "out_proj": lin_init(ks[6], dk * N_HEADS, D_LLM),
        "head": lin_init(ks[7], HEAD_NF, PRED_LEN),
    }


def prepare_inference_params(params):
    """Fold every input-independent branch into static tensors (run ONCE)."""
    # source_embeddings = mapping_layer(word_embeddings.T).T -> (S, d_llm)
    we = params["word_embeddings"]
    w_map, b_map = params["mapping"]
    src = (we.T @ w_map + b_map).T                        # (NUM_TOKENS, D_LLM)

    # K / V projections of the (parameter-only) source embeddings.
    wk, bk = params["k_proj"]
    wv, bv = params["v_proj"]
    k = (src @ wk + bk).reshape(NUM_TOKENS, N_HEADS, D_FF)   # (S, H, dk)
    v = (src @ wv + bv).reshape(NUM_TOKENS, N_HEADS, D_FF)

    # Block-diagonal K^T : (HD, H*S).  Column group h <-> head h's S scores.
    kt_blk = jnp.zeros((HD, HS), jnp.float32)
    for h in range(N_HEADS):
        kt_blk = kt_blk.at[h * D_FF:(h + 1) * D_FF,
                           h * NUM_TOKENS:(h + 1) * NUM_TOKENS].set(k[:, h, :].T)

    # Augmented value matrix: [ block-diag V  |  per-head group-sum ones ].
    v_aug = jnp.zeros((HS, 2 * HD), jnp.float32)
    for h in range(N_HEADS):
        rows = slice(h * NUM_TOKENS, (h + 1) * NUM_TOKENS)
        v_aug = v_aug.at[rows, h * D_FF:(h + 1) * D_FF].set(v[:, h, :])
        v_aug = v_aug.at[rows, HD + h * D_FF:HD + (h + 1) * D_FF].set(1.0)

    # Fuse patch value-embedding with the Q projection (both affine), then fold
    # the replication-pad + unfold selection into one (T, PN*HD) weight.
    # TODO(synk): reference TokenEmbedding is a circular Conv1d; a linear
    # patch->d_model value embedding is used instead (then composed with Wq).
    w_pe, b_pe = params["patch_value"]
    wq, bq = params["q_proj"]
    wq_fused = w_pe @ wq                                  # (PATCH_LEN, HD)
    bq_fused = b_pe @ wq + bq                             # (HD,)
    blocks = []
    for p in range(PATCH_NUMS):
        idx = jnp.minimum(p * STRIDE + jnp.arange(PATCH_LEN), SEQ_LEN - 1)
        sel = jax.nn.one_hot(idx, SEQ_LEN, dtype=jnp.float32).T   # (T, PATCH_LEN)
        blocks.append(sel @ wq_fused)                     # (T, HD)
    wq_big = jnp.concatenate(blocks, axis=1)              # (T, PN*HD)
    bq_big = jnp.tile(bq_fused, PATCH_NUMS).reshape(1, QW)

    # Fold out_projection[:d_ff] (LLaMA == identity) + FlattenHead.
    wo, bo = params["out_proj"]
    wh, bh = params["head"]
    wo_s = wo[:, :D_FF]                                   # (HD, D_FF)
    bo_s = bo[:D_FF]                                      # (D_FF,)
    wh3 = wh.reshape(D_FF, PATCH_NUMS, PRED_LEN)          # flatten order d*PN+p
    who = jnp.stack([wo_s @ wh3[:, p, :] for p in range(PATCH_NUMS)], axis=0)
    b_fused = bh + sum(bo_s @ wh3[:, p, :] for p in range(PATCH_NUMS))

    return {"wq_big": wq_big.astype(jnp.bfloat16),
            "bq_big": bq_big,
            "kt_blk": kt_blk.astype(jnp.bfloat16),
            "v_aug": v_aug,
            "who": who,
            "b_fused": b_fused.reshape(1, PRED_LEN)}


# =============================== wrapper ===============================

def _num_grid_steps(rows):
    # v7x has 2 TensorCores -> 2 fat "parallel" steps when the block stays
    # sublane-aligned; otherwise collapse to a single step (v5e/v6e have 1 TC).
    if rows % 2 == 0 and (rows // 2) % 8 == 0:
        return 2
    return 1


def forward(prepared, x_enc, x_mark_enc=None, x_dec=None, x_mark_dec=None):
    # (B, T, N) -> (B*N, T): one row per (batch, variate), time on lanes.
    B, T, N = x_enc.shape
    x2 = jnp.transpose(x_enc, (0, 2, 1)).reshape(B * N, T)
    y2 = fused_forecast(x2, prepared, _num_grid_steps(B * N))   # (B*N, PRED)
    y = jnp.transpose(y2.reshape(B, N, PRED_LEN), (0, 2, 1))    # (B, PRED, N)
    return y[:, -PRED_LEN:, :]


if __name__ == "__main__":
    key = jax.random.PRNGKey(0)
    kx, kp = jax.random.split(key)

    B, N_VARS = 8, 4
    x_enc = jax.random.normal(kx, (B, SEQ_LEN, N_VARS), jnp.float32)
    x_mark_enc = jnp.zeros((B, SEQ_LEN, 4), jnp.float32)    # unused (prompt path)
    x_dec = jnp.zeros((B, PRED_LEN, N_VARS), jnp.float32)   # unused
    x_mark_dec = jnp.zeros((B, PRED_LEN, 4), jnp.float32)   # unused

    params = init_params(kp)
    prepared = prepare_inference_params(params)             # run once, param-only
    run = jax.jit(forward)

    out = jax.block_until_ready(run(prepared, x_enc, x_mark_enc, x_dec, x_mark_dec))

    assert out.shape == (B, PRED_LEN, N_VARS), out.shape
    assert bool(jnp.all(jnp.isfinite(out)))
    print("KERNEL_OK")
</pallas_src>

<mosaic_0001>
module attributes {stable_mosaic.version = 11 : i64} {
  func.func @_fused_forecast_kernel(%arg0: i32, %arg1: memref<16x32xf32, #tpu.memory_space<vmem>>, %arg2: memref<32x512xbf16, #tpu.memory_space<vmem>>, %arg3: memref<1x512xf32, #tpu.memory_space<vmem>>, %arg4: memref<128x256xbf16, #tpu.memory_space<vmem>>, %arg5: memref<256x256xf32, #tpu.memory_space<vmem>>, %arg6: memref<4x128x8xf32, #tpu.memory_space<vmem>>, %arg7: memref<1x8xf32, #tpu.memory_space<vmem>>, %arg8: memref<16x8xf32, #tpu.memory_space<vmem>>) attributes {dimension_semantics = [#tpu.dimension_semantics<parallel>], iteration_bounds = array<i64: 2>, scalar_prefetch = 0 : i64, scratch_operands = 0 : i64, tpu.core_type = #tpu.core_type<tc>, window_params = [{transform_indices = @transform_0, window_bounds = array<i64: 16, 32>}, {pipeline_mode = #tpu.pipeline_mode<synchronous>, transform_indices = @transform_1, window_bounds = array<i64: 32, 512>}, {pipeline_mode = #tpu.pipeline_mode<synchronous>, transform_indices = @transform_2, window_bounds = array<i64: 1, 512>}, {pipeline_mode = #tpu.pipeline_mode<synchronous>, transform_indices = @transform_3, window_bounds = array<i64: 128, 256>}, {pipeline_mode = #tpu.pipeline_mode<synchronous>, transform_indices = @transform_4, window_bounds = array<i64: 256, 256>}, {pipeline_mode = #tpu.pipeline_mode<synchronous>, transform_indices = @transform_5, window_bounds = array<i64: 4, 128, 8>}, {pipeline_mode = #tpu.pipeline_mode<synchronous>, transform_indices = @transform_6, window_bounds = array<i64: 1, 8>}, {transform_indices = @transform_7, window_bounds = array<i64: 16, 8>}]} {
    %c0 = arith.constant 0 : index
    %c0_0 = arith.constant 0 : index
    %0 = vector.load %arg1[%c0, %c0_0] : memref<16x32xf32, #tpu.memory_space<vmem>>, vector<16x32xf32>
    %cst = arith.constant dense<0.000000e+00> : vector<16xf32>
    %1 = vector.multi_reduction <add>, %0, %cst [1] : vector<16x32xf32> to vector<16xf32>
    %2 = vector.shape_cast %1 : vector<16xf32> to vector<16x1xf32>
    %cst_1 = arith.constant 3.200000e+01 : f32
    %3 = vector.broadcast %cst_1 : f32 to vector<16x1xf32>
    %4 = arith.divf %2, %3 : vector<16x1xf32>
    %5 = vector.broadcast %4 : vector<16x1xf32> to vector<16x32xf32>
    %6 = arith.subf %0, %5 : vector<16x32xf32>
    %7 = arith.mulf %6, %6 : vector<16x32xf32>
    %cst_2 = arith.constant dense<0.000000e+00> : vector<16xf32>
    %8 = vector.multi_reduction <add>, %7, %cst_2 [1] : vector<16x32xf32> to vector<16xf32>
    %9 = vector.shape_cast %8 : vector<16xf32> to vector<16x1xf32>
    %cst_3 = arith.constant 3.200000e+01 : f32
    %10 = vector.broadcast %cst_3 : f32 to vector<16x1xf32>
    %11 = arith.divf %9, %10 : vector<16x1xf32>
    %cst_4 = arith.constant 9.99999974E-6 : f32
    %12 = vector.broadcast %cst_4 : f32 to vector<16x1xf32>
    %13 = arith.addf %11, %12 : vector<16x1xf32>
    %14 = math.rsqrt %13 : vector<16x1xf32>
    %cst_5 = arith.constant 9.99999974E-6 : f32
    %15 = vector.broadcast %cst_5 : f32 to vector<16x1xf32>
    %16 = arith.addf %11, %15 : vector<16x1xf32>
    %17 = arith.mulf %16, %14 : vector<16x1xf32>
    %18 = vector.broadcast %14 : vector<16x1xf32> to vector<16x32xf32>
    %19 = arith.mulf %6, %18 : vector<16x32xf32>
    %20 = arith.truncf %19 : vector<16x32xf32> to vector<16x32xbf16>
    %c0_6 = arith.constant 0 : index
    %c0_7 = arith.constant 0 : index
    %21 = vector.load %arg2[%c0_6, %c0_7] : memref<32x512xbf16, #tpu.memory_space<vmem>>, vector<32x512xbf16>
    %cst_8 = arith.constant dense<0.000000e+00> : vector<16x512xf32>
    %22 = tpu.matmul %20, %21, %cst_8 {dimension_numbers = #tpu.dot_dimension_numbers<[1], [0], [0], [1], [0, 0, 1, 1], [], []>} : vector<16x32xbf16>, vector<32x512xbf16>, vector<16x512xf32> -> vector<16x512xf32>
    %c0_9 = arith.constant 0 : index
    %c0_10 = arith.constant 0 : index
    %23 = vector.load %arg3[%c0_9, %c0_10] : memref<1x512xf32, #tpu.memory_space<vmem>>, vector<1x512xf32>
    %24 = vector.broadcast %23 : vector<1x512xf32> to vector<16x512xf32>
    %25 = arith.addf %22, %24 : vector<16x512xf32>
    %cst_11 = arith.constant 3.200000e+01 : f32
    %26 = math.sqrt %cst_11 : f32
    %cst_12 = arith.constant 1.000000e+00 : f32
    %27 = arith.divf %cst_12, %26 : f32
    %28 = vector.extract_strided_slice %25 {offsets = [0, 0], sizes = [16, 128], strides = [1, 1]} : vector<16x512xf32> to vector<16x128xf32>
    %29 = arith.truncf %28 : vector<16x128xf32> to vector<16x128xbf16>
    %c0_13 = arith.constant 0 : index
    %c0_14 = arith.constant 0 : index
    %30 = vector.load %arg4[%c0_13, %c0_14] : memref<128x256xbf16, #tpu.memory_space<vmem>>, vector<128x256xbf16>
    %cst_15 = arith.constant dense<0.000000e+00> : vector<16x256xf32>
    %31 = tpu.matmul %29, %30, %cst_15 {dimension_numbers = #tpu.dot_dimension_numbers<[1], [0], [0], [1], [0, 0, 1, 1], [], []>} : vector<16x128xbf16>, vector<128x256xbf16>, vector<16x256xf32> -> vector<16x256xf32>
    %32 = vector.broadcast %27 : f32 to vector<16x256xf32>
    %33 = arith.mulf %31, %32 : vector<16x256xf32>
    %cst_16 = arith.constant dense<0xFF800000> : vector<16xf32>
    %34 = vector.multi_reduction <maximumf>, %33, %cst_16 [1] : vector<16x256xf32> to vector<16xf32>
    %35 = vector.shape_cast %34 : vector<16xf32> to vector<16x1xf32>
    %36 = vector.broadcast %35 : vector<16x1xf32> to vector<16x256xf32>
    %37 = arith.subf %33, %36 : vector<16x256xf32>
    %38 = math.exp %37 : vector<16x256xf32>
    %c0_17 = arith.constant 0 : index
    %c0_18 = arith.constant 0 : index
    %39 = vector.load %arg5[%c0_17, %c0_18] : memref<256x256xf32, #tpu.memory_space<vmem>>, vector<256x256xf32>
    %cst_19 = arith.constant dense<0.000000e+00> : vector<16x256xf32>
    %40 = tpu.matmul %38, %39, %cst_19 {dimension_numbers = #tpu.dot_dimension_numbers<[1], [0], [0], [1], [0, 0, 1, 1], [], []>} : vector<16x256xf32>, vector<256x256xf32>, vector<16x256xf32> -> vector<16x256xf32>
    %41 = vector.extract_strided_slice %40 {offsets = [0, 0], sizes = [16, 128], strides = [1, 1]} : vector<16x256xf32> to vector<16x128xf32>
    %42 = vector.extract_strided_slice %40 {offsets = [0, 128], sizes = [16, 128], strides = [1, 1]} : vector<16x256xf32> to vector<16x128xf32>
    %cst_20 = arith.constant 1.000000e-30 : f32
    %43 = vector.broadcast %cst_20 : f32 to vector<16x128xf32>
    %44 = arith.maximumf %42, %43 : vector<16x128xf32>
    %45 = tpu.reciprocal %44 {approx = true} : vector<16x128xf32> -> vector<16x128xf32>
    %46 = arith.mulf %41, %45 : vector<16x128xf32>
    %c0_21 = arith.constant 0 : index
    %c0_22 = arith.constant 0 : index
    %c0_23 = arith.constant 0 : index
    %47 = vector.load %arg6[%c0_21, %c0_22, %c0_23] : memref<4x128x8xf32, #tpu.memory_space<vmem>>, vector<1x128x8xf32>
    %48 = vector.shape_cast %47 : vector<1x128x8xf32> to vector<128x8xf32>
    %cst_24 = arith.constant dense<0.000000e+00> : vector<16x8xf32>
    %49 = tpu.matmul %46, %48, %cst_24 {dimension_numbers = #tpu.dot_dimension_numbers<[1], [0], [0], [1], [0, 0, 1, 1], [], []>} : vector<16x128xf32>, vector<128x8xf32>, vector<16x8xf32> -> vector<16x8xf32>
    %50 = vector.extract_strided_slice %25 {offsets = [0, 128], sizes = [16, 128], strides = [1, 1]} : vector<16x512xf32> to vector<16x128xf32>
    %51 = arith.truncf %50 : vector<16x128xf32> to vector<16x128xbf16>
    %c0_25 = arith.constant 0 : index
    %c0_26 = arith.constant 0 : index
    %52 = vector.load %arg4[%c0_25, %c0_26] : memref<128x256xbf16, #tpu.memory_space<vmem>>, vector<128x256xbf16>
    %cst_27 = arith.constant dense<0.000000e+00> : vector<16x256xf32>
    %53 = tpu.matmul %51, %52, %cst_27 {dimension_numbers = #tpu.dot_dimension_numbers<[1], [0], [0], [1], [0, 0, 1, 1], [], []>} : vector<16x128xbf16>, vector<128x256xbf16>, vector<16x256xf32> -> vector<16x256xf32>
    %54 = vector.broadcast %27 : f32 to vector<16x256xf32>
    %55 = arith.mulf %53, %54 : vector<16x256xf32>
    %cst_28 = arith.constant dense<0xFF800000> : vector<16xf32>
    %56 = vector.multi_reduction <maximumf>, %55, %cst_28 [1] : vector<16x256xf32> to vector<16xf32>
    %57 = vector.shape_cast %56 : vector<16xf32> to vector<16x1xf32>
    %58 = vector.broadcast %57 : vector<16x1xf32> to vector<16x256xf32>
    %59 = arith.subf %55, %58 : vector<16x256xf32>
    %60 = math.exp %59 : vector<16x256xf32>
    %c0_29 = arith.constant 0 : index
    %c0_30 = arith.constant 0 : index
    %61 = vector.load %arg5[%c0_29, %c0_30] : memref<256x256xf32, #tpu.memory_space<vmem>>, vector<256x256xf32>
    %cst_31 = arith.constant dense<0.000000e+00> : vector<16x256xf32>
    %62 = tpu.matmul %60, %61, %cst_31 {dimension_numbers = #tpu.dot_dimension_numbers<[1], [0], [0], [1], [0, 0, 1, 1], [], []>} : vector<16x256xf32>, vector<256x256xf32>, vector<16x256xf32> -> vector<16x256xf32>
    %63 = vector.extract_strided_slice %62 {offsets = [0, 0], sizes = [16, 128], strides = [1, 1]} : vector<16x256xf32> to vector<16x128xf32>
    %64 = vector.extract_strided_slice %62 {offsets = [0, 128], sizes = [16, 128], strides = [1, 1]} : vector<16x256xf32> to vector<16x128xf32>
    %cst_32 = arith.constant 1.000000e-30 : f32
    %65 = vector.broadcast %cst_32 : f32 to vector<16x128xf32>
    %66 = arith.maximumf %64, %65 : vector<16x128xf32>
    %67 = tpu.reciprocal %66 {approx = true} : vector<16x128xf32> -> vector<16x128xf32>
    %68 = arith.mulf %63, %67 : vector<16x128xf32>
    %c1 = arith.constant 1 : index
    %c0_33 = arith.constant 0 : index
    %c0_34 = arith.constant 0 : index
    %69 = vector.load %arg6[%c1, %c0_33, %c0_34] : memref<4x128x8xf32, #tpu.memory_space<vmem>>, vector<1x128x8xf32>
    %70 = vector.shape_cast %69 : vector<1x128x8xf32> to vector<128x8xf32>
    %cst_35 = arith.constant dense<0.000000e+00> : vector<16x8xf32>
    %71 = tpu.matmul %68, %70, %cst_35 {dimension_numbers = #tpu.dot_dimension_numbers<[1], [0], [0], [1], [0, 0, 1, 1], [], []>} : vector<16x128xf32>, vector<128x8xf32>, vector<16x8xf32> -> vector<16x8xf32>
    %72 = arith.addf %49, %71 : vector<16x8xf32>
    %73 = vector.extract_strided_slice %25 {offsets = [0, 256], sizes = [16, 128], strides = [1, 1]} : vector<16x512xf32> to vector<16x128xf32>
    %74 = arith.truncf %73 : vector<16x128xf32> to vector<16x128xbf16>
    %c0_36 = arith.constant 0 : index
    %c0_37 = arith.constant 0 : index
    %75 = vector.load %arg4[%c0_36, %c0_37] : memref<128x256xbf16, #tpu.memory_space<vmem>>, vector<128x256xbf16>
    %cst_38 = arith.constant dense<0.000000e+00> : vector<16x256xf32>
    %76 = tpu.matmul %74, %75, %cst_38 {dimension_numbers = #tpu.dot_dimension_numbers<[1], [0], [0], [1], [0, 0, 1, 1], [], []>} : vector<16x128xbf16>, vector<128x256xbf16>, vector<16x256xf32> -> vector<16x256xf32>
    %77 = vector.broadcast %27 : f32 to vector<16x256xf32>
    %78 = arith.mulf %76, %77 : vector<16x256xf32>
    %cst_39 = arith.constant dense<0xFF800000> : vector<16xf32>
    %79 = vector.multi_reduction <maximumf>, %78, %cst_39 [1] : vector<16x256xf32> to vector<16xf32>
    %80 = vector.shape_cast %79 : vector<16xf32> to vector<16x1xf32>
    %81 = vector.broadcast %80 : vector<16x1xf32> to vector<16x256xf32>
    %82 = arith.subf %78, %81 : vector<16x256xf32>
    %83 = math.exp %82 : vector<16x256xf32>
    %c0_40 = arith.constant 0 : index
    %c0_41 = arith.constant 0 : index
    %84 = vector.load %arg5[%c0_40, %c0_41] : memref<256x256xf32, #tpu.memory_space<vmem>>, vector<256x256xf32>
    %cst_42 = arith.constant dense<0.000000e+00> : vector<16x256xf32>
    %85 = tpu.matmul %83, %84, %cst_42 {dimension_numbers = #tpu.dot_dimension_numbers<[1], [0], [0], [1], [0, 0, 1, 1], [], []>} : vector<16x256xf32>, vector<256x256xf32>, vector<16x256xf32> -> vector<16x256xf32>
    %86 = vector.extract_strided_slice %85 {offsets = [0, 0], sizes = [16, 128], strides = [1, 1]} : vector<16x256xf32> to vector<16x128xf32>
    %87 = vector.extract_strided_slice %85 {offsets = [0, 128], sizes = [16, 128], strides = [1, 1]} : vector<16x256xf32> to vector<16x128xf32>
    %cst_43 = arith.constant 1.000000e-30 : f32
    %88 = vector.broadcast %cst_43 : f32 to vector<16x128xf32>
    %89 = arith.maximumf %87, %88 : vector<16x128xf32>
    %90 = tpu.reciprocal %89 {approx = true} : vector<16x128xf32> -> vector<16x128xf32>
    %91 = arith.mulf %86, %90 : vector<16x128xf32>
    %c2 = arith.constant 2 : index
    %c0_44 = arith.constant 0 : index
    %c0_45 = arith.constant 0 : index
    %92 = vector.load %arg6[%c2, %c0_44, %c0_45] : memref<4x128x8xf32, #tpu.memory_space<vmem>>, vector<1x128x8xf32>
    %93 = vector.shape_cast %92 : vector<1x128x8xf32> to vector<128x8xf32>
    %cst_46 = arith.constant dense<0.000000e+00> : vector<16x8xf32>
    %94 = tpu.matmul %91, %93, %cst_46 {dimension_numbers = #tpu.dot_dimension_numbers<[1], [0], [0], [1], [0, 0, 1, 1], [], []>} : vector<16x128xf32>, vector<128x8xf32>, vector<16x8xf32> -> vector<16x8xf32>
    %95 = arith.addf %72, %94 : vector<16x8xf32>
    %96 = vector.extract_strided_slice %25 {offsets = [0, 384], sizes = [16, 128], strides = [1, 1]} : vector<16x512xf32> to vector<16x128xf32>
    %97 = arith.truncf %96 : vector<16x128xf32> to vector<16x128xbf16>
    %c0_47 = arith.constant 0 : index
    %c0_48 = arith.constant 0 : index
    %98 = vector.load %arg4[%c0_47, %c0_48] : memref<128x256xbf16, #tpu.memory_space<vmem>>, vector<128x256xbf16>
    %cst_49 = arith.constant dense<0.000000e+00> : vector<16x256xf32>
    %99 = tpu.matmul %97, %98, %cst_49 {dimension_numbers = #tpu.dot_dimension_numbers<[1], [0], [0], [1], [0, 0, 1, 1], [], []>} : vector<16x128xbf16>, vector<128x256xbf16>, vector<16x256xf32> -> vector<16x256xf32>
    %100 = vector.broadcast %27 : f32 to vector<16x256xf32>
    %101 = arith.mulf %99, %100 : vector<16x256xf32>
    %cst_50 = arith.constant dense<0xFF800000> : vector<16xf32>
    %102 = vector.multi_reduction <maximumf>, %101, %cst_50 [1] : vector<16x256xf32> to vector<16xf32>
    %103 = vector.shape_cast %102 : vector<16xf32> to vector<16x1xf32>
    %104 = vector.broadcast %103 : vector<16x1xf32> to vector<16x256xf32>
    %105 = arith.subf %101, %104 : vector<16x256xf32>
    %106 = math.exp %105 : vector<16x256xf32>
    %c0_51 = arith.constant 0 : index
    %c0_52 = arith.constant 0 : index
    %107 = vector.load %arg5[%c0_51, %c0_52] : memref<256x256xf32, #tpu.memory_space<vmem>>, vector<256x256xf32>
    %cst_53 = arith.constant dense<0.000000e+00> : vector<16x256xf32>
    %108 = tpu.matmul %106, %107, %cst_53 {dimension_numbers = #tpu.dot_dimension_numbers<[1], [0], [0], [1], [0, 0, 1, 1], [], []>} : vector<16x256xf32>, vector<256x256xf32>, vector<16x256xf32> -> vector<16x256xf32>
    %109 = vector.extract_strided_slice %108 {offsets = [0, 0], sizes = [16, 128], strides = [1, 1]} : vector<16x256xf32> to vector<16x128xf32>
    %110 = vector.extract_strided_slice %108 {offsets = [0, 128], sizes = [16, 128], strides = [1, 1]} : vector<16x256xf32> to vector<16x128xf32>
    %cst_54 = arith.constant 1.000000e-30 : f32
    %111 = vector.broadcast %cst_54 : f32 to vector<16x128xf32>
    %112 = arith.maximumf %110, %111 : vector<16x128xf32>
    %113 = tpu.reciprocal %112 {approx = true} : vector<16x128xf32> -> vector<16x128xf32>
    %114 = arith.mulf %109, %113 : vector<16x128xf32>
    %c3 = arith.constant 3 : index
    %c0_55 = arith.constant 0 : index
    %c0_56 = arith.constant 0 : index
    %115 = vector.load %arg6[%c3, %c0_55, %c0_56] : memref<4x128x8xf32, #tpu.memory_space<vmem>>, vector<1x128x8xf32>
    %116 = vector.shape_cast %115 : vector<1x128x8xf32> to vector<128x8xf32>
    %cst_57 = arith.constant dense<0.000000e+00> : vector<16x8xf32>
    %117 = tpu.matmul %114, %116, %cst_57 {dimension_numbers = #tpu.dot_dimension_numbers<[1], [0], [0], [1], [0, 0, 1, 1], [], []>} : vector<16x128xf32>, vector<128x8xf32>, vector<16x8xf32> -> vector<16x8xf32>
    %118 = arith.addf %95, %117 : vector<16x8xf32>
    %c0_58 = arith.constant 0 : index
    %c0_59 = arith.constant 0 : index
    %119 = vector.load %arg7[%c0_58, %c0_59] : memref<1x8xf32, #tpu.memory_space<vmem>>, vector<1x8xf32>
    %120 = vector.broadcast %119 : vector<1x8xf32> to vector<16x8xf32>
    %121 = arith.addf %118, %120 : vector<16x8xf32>
    %122 = vector.broadcast %17 : vector<16x1xf32> to vector<16x8xf32>
    %123 = arith.mulf %121, %122 : vector<16x8xf32>
    %124 = vector.broadcast %4 : vector<16x1xf32> to vector<16x8xf32>
    %125 = arith.addf %123, %124 : vector<16x8xf32>
    %c0_60 = arith.constant 0 : index
    %c0_61 = arith.constant 0 : index
    %126 = vector.load %arg8[%c0_60, %c0_61] : memref<16x8xf32, #tpu.memory_space<vmem>>, vector<16x8xf32>
    tpu.vector_store %arg8[%c0_60, %c0_61], %125 {strides = array<i32>} : memref<16x8xf32, #tpu.memory_space<vmem>>, vector<16x8xf32>,
    return
  }
  func.func @transform_0(%arg0: i32) -> (i32, i32) {
    %c0_i32 = arith.constant 0 : i32
    %c0_i32_0 = arith.constant 0 : i32
    return %arg0, %c0_i32 : i32, i32
  }
  func.func @transform_1(%arg0: i32) -> (i32, i32) {
    %c0_i32 = arith.constant 0 : i32
    %c0_i32_0 = arith.constant 0 : i32
    %c0_i32_1 = arith.constant 0 : i32
    return %c0_i32, %c0_i32_0 : i32, i32
  }
  func.func @transform_2(%arg0: i32) -> (i32, i32) {
    %c0_i32 = arith.constant 0 : i32
    %c0_i32_0 = arith.constant 0 : i32
    %c0_i32_1 = arith.constant 0 : i32
    return %c0_i32, %c0_i32_0 : i32, i32
  }
  func.func @transform_3(%arg0: i32) -> (i32, i32) {
    %c0_i32 = arith.constant 0 : i32
    %c0_i32_0 = arith.constant 0 : i32
    %c0_i32_1 = arith.constant 0 : i32
    return %c0_i32, %c0_i32_0 : i32, i32
  }
  func.func @transform_4(%arg0: i32) -> (i32, i32) {
    %c0_i32 = arith.constant 0 : i32
    %c0_i32_0 = arith.constant 0 : i32
    %c0_i32_1 = arith.constant 0 : i32
    return %c0_i32, %c0_i32_0 : i32, i32
  }
  func.func @transform_5(%arg0: i32) -> (i32, i32, i32) {
    %c0_i32 = arith.constant 0 : i32
    %c0_i32_0 = arith.constant 0 : i32
    %c0_i32_1 = arith.constant 0 : i32
    %c0_i32_2 = arith.constant 0 : i32
    return %c0_i32, %c0_i32_0, %c0_i32_1 : i32, i32, i32
  }
  func.func @transform_6(%arg0: i32) -> (i32, i32) {
    %c0_i32 = arith.constant 0 : i32
    %c0_i32_0 = arith.constant 0 : i32
    %c0_i32_1 = arith.constant 0 : i32
    return %c0_i32, %c0_i32_0 : i32, i32
  }
  func.func @transform_7(%arg0: i32) -> (i32, i32) {
    %c0_i32 = arith.constant 0 : i32
    %c0_i32_0 = arith.constant 0 : i32
    return %arg0, %c0_i32 : i32, i32
  }
}

</mosaic_0001>

<bundles_post_ra>
// kernel: forward.1
= control target key start
LH: loop header
LB: loop body
LE: loop exit
PB: predicated region body
PF: predicated region fallthrough
CT: control target
= control target key end

     0   :  { %12 = vsyncpa [#allocation3], 0  ;;  %s3515_s0 = inlined_call_operand.vmem [shape: f32[32,32], index: 0, kind: input, shape index: {}]   ;;  %s3516_s1 = inlined_call_operand.hbm [shape: bf16[32,512], index: 1, kind: input, shape index: {}]   ;;  %s3517_s2 = inlined_call_operand.vmem [shape: f32[1,512], index: 2, kind: input, shape index: {}]   ;;  %s3518_s3 = inlined_call_operand.hbm [shape: bf16[128,256], index: 3, kind: input, shape index: {}]   ;;  %s3519_s4 = inlined_call_operand.vmem [shape: f32[256,256], index: 4, kind: input, shape index: {}]   ;;  %s3520_s5 = inlined_call_operand.vmem [shape: f32[4,128,8], index: 5, kind: input, shape index: {}]   ;;  %s3521_s6 = inlined_call_operand.vmem [shape: f32[1,8], index: 6, kind: input, shape index: {}]   ;;  %s3522_s7 = inlined_call_operand.hbm [shape: f32[32,8], index: 7, kind: output, shape index: {}]  }
   0x1   :  { %13 = vsyncpa [#allocation6], 0 }
   0x2   :  { %14 = vsyncpa [#allocation4], 0 }
   0x3   :  { %16 = vsyncpa [#allocation4 + $0x1], 0  ;;  %s2399_s24 = smov 0   ;;  %s2401_s25 = smov 0  }
   0x4   :  { %s2403_s26 = smov 0   ;;  %s2405_s27 = smov 0  }
   0x5 LB: > { %s2420_s28 = sadd.s32 4294967295, %s2347_s27   ;;  %s1744_s29 = sadd.s32 4294967294, %s2347_s27   ;;  %s2347_s27 = sphi %s2405_s27, %s3729_s27   ;;  %s2343_s26 = sphi %s2403_s26, %s3728_s26   ;;  %s2339_s25 = sphi %s2401_s25, %s3727_s25   ;;  %s2335_s24 = sphi %s2399_s24, %s3726_s24  }
   0x6   : > { %s2424_s30 = sadd.s32 1, %s2347_s27   ;;  %s181_s8 = sadd.s32 1, %s2343_s26 }
   0x7   : > { %s178_s9 = ssub.s32 %s2347_s27, %s2424_s30  ;;  %p191_p0 = scmp.ne.s32.totalorder %s2343_s26, %s2339_s25 }
   0x8   : > { %p179_p1 = scmp.eq.s32.totalorder %s178_s9, 0  ;;  %p192_p2 = scmp.eq.s32.totalorder %s2420_s28, 1 }
   0x9   : > { %p197_p3 = scmp.ne.s32.totalorder %s2339_s25, %s2335_s24  ;;  %p198_p4 = scmp.eq.s32.totalorder %s1744_s29, 1 }
   0xa   : > { %s2435_s10 = scalar_select %p179_p1, %s2343_s26, %s181_s8  }
   0xb   : > { %p2437_p5 = por %p192_p2, %p191_p0  ;;  %p2441_p6 = por %p198_p4, %p197_p3 }
   0xc   : > { %p1745_p7 = scmp.ge.s32.totalorder %s2347_s27, 1  ;;  %p205_p8 = scmp.lt.s32.totalorder %s2347_s27, 3 }
   0xd   : > { %s3612_s12 = scalar_select %p2441_p6, 1, 0 }
   0xe   : > { %p3523_p9 = scmp.eq.s32.totalorder %s2420_s28, 0  ;;  %p2448_p10 = pnand %p1745_p7, %p205_p8 }
   0xf   : > { %s2349_s14 = smov [#allocation2]   ;;  %s2350_s17 = smov [#allocation5]  }
  0x10   : > { %s217_s15 = sshll.u32 %s2349_s14, 4  ;;  %p2058_p11 = pneg %p2448_p10  ;;  %s218_s15 = int_to_ptr.vmem [resolvable:$true] %s217_s15 }
  0x11   : > { %s233_s18 = sshll.u32 %s2350_s17, 4  ;;  %s2238_s19 = scalar_lea.vmem %s218_s15, 1024  ;;  %s234_s18 = int_to_ptr.vmem [resolvable:$true] %s233_s18 }
  0x12   : > { %p2456_p12 = pnand %p3523_p9, %p2058_p11  ;;  %p2239_p0 = scmp.ne.s32.totalorder %s218_s15, %s2238_s19 }
  0x13   : > { %p2246_p3 = scmp.lt.s32.totalorder %s218_s15, %s218_s15  ;;  %p2247_p4 = scmp.lt.s32.totalorder %s2238_s19, %s2238_s19 }
  0x14   : > { %p2229_p13 = pneg %p2456_p12 }
  0x15   : > { %p2248_p7 = por %p2247_p4, %p2246_p3 }
  0x16   : > { %p2241_p1 = pnand %p2239_p0, %p2229_p13 }
  0x18   : > { %p2242_p2 = pneg %p2241_p1 }
  0x1a   : > { %p2249_p8 = pnand %p2248_p7, %p2242_p2 }
  0x1c   : > { %2252 = shalt.err (!%p2249_p8)
}
  0x1d   : > { %s2351_s20 = smov 256   ;;  %s2352_s21 = smov 16  }
  0x1e   : > { %2061 = dma.hbm_to_vmem [thread:$0]  (!%p2456_p12), %s3516_s1, 1024, %s218_s15, [#allocation3], %s2351_s20, %s2351_s20, %s2352_s21  }
  0x1f   : > { %s2264_s29 = scalar_lea.vmem %s234_s18, 2048  ;;  %p2272_p9 = scmp.lt.s32.totalorder %s234_s18, %s234_s18 }
  0x20   : > { %p2265_p11 = scmp.ne.s32.totalorder %s234_s18, %s2264_s29  ;;  %p2273_p6 = scmp.lt.s32.totalorder %s2264_s29, %s2264_s29 }
  0x22   : > { %p2267_p0 = pnand %p2265_p11, %p2229_p13  ;;  %p2274_p3 = por %p2273_p6, %p2272_p9 }
  0x24   : > { %p2268_p1 = pneg %p2267_p0 }
  0x26   : > { %p2275_p2 = pnand %p2274_p3, %p2268_p1 }
  0x28   : > { %2278 = shalt.err (!%p2275_p2)
}
  0x29   : > { %s2353_s8 = smov 128   ;;  %s2354_s9 = smov 8  }
  0x2a   : > { %2064 = dma.hbm_to_vmem [thread:$0]  (!%p2456_p12), %s3518_s3, 2048, %s234_s18, [#allocation6], %s2353_s8, %s2353_s8, %s2354_s9  }
  0x2b   : > { %267 = sbr.rel (%p2448_p10) target bundleno = 2390 (0x956), region = 48 }
  0x30   : > { %p3615_p4 = scmp.eq.s32.totalorder %s2420_s28, 0 }
  0x32   : > { %2322 = dma.done.wait (%p3615_p4), [#allocation3], 1024   ;;  %p3616_p13 = pmov %p3615_p4 }
  0x33   : > { %p3617_p6 = pmov %p3615_p4 }
  0x34   : > { %2324 = vsyncadd (%p3616_p13), [#allocation3], 4294966272 }
  0x35   : > { %2326 = dma.done.wait (%p3617_p6), [#allocation6], 2048   ;;  %p3618_p9 = pmov %p3615_p4 }
  0x36   : > { %s1753_s15 = sshll.u32 %s2420_s28, 1  ;;  %vm313_vm0 = vcmask 261120   ;;  %v2115_v14 = vld [vmem:[#allocation2 + $0x24] ss:$16 sps:$4 sm:$0xff]   ;;  %v2117_v15 = vld [vmem:[#allocation2 + $0x2c] ss:$16 sps:$4 sm:$0xff]   ;;  %v354_v52 = vlaneseq }
  0x37   : > { %2328 = vsyncadd (%p3618_p9), [#allocation6], 4294965248  ;;  %p304_p7 = scmp.lt.s32.totalorder %s1753_s15, 3  ;;  %v2119_v16 = vld [vmem:[#allocation2 + $0x20] ss:$16 sps:$4 sm:$0xff]   ;;  %429 = vmatprep.subr.bf16.mxu0 %v2115_v14  ;;  %472 = vmatprep.subr.bf16.mxu1 %v2117_v15  ;;  %v3524_v22 = vmov 0  }
  0x38   : > { %v2120_v17 = vld [vmem:[#allocation2 + $0x28] ss:$16 sps:$4 sm:$0xff]   ;;  %430 = vmatpush1.bf16.msra.mxu0 %v2119_v16  ;;  %v2121_v18 = vld [vmem:[#allocation2 + $0x4] ss:$16 sps:$4 sm:$0xff]   ;;  %v2123_v19 = vld [vmem:[#allocation2 + $0xc] ss:$16 sps:$4 sm:$0xff]   ;;  %449 = vmatprep.mubr.bf16.mxu0 %v3524_v22 }
  0x39   : > { %s3731_s15 = smov (!%p304_p7, %s1753_s15), 3  ;;  %473 = vmatpush1.bf16.msra.mxu1 %v2120_v17  ;;  %v2125_v20 = vld [vmem:[#allocation2] ss:$16 sps:$4 sm:$0xff]   ;;  %v2126_v21 = vld [vmem:[#allocation2 + $0x8] ss:$16 sps:$4 sm:$0xff]   ;;  %431 = vmatprep.subr.bf16.mxu0 %v2121_v18  ;;  %v2560_v53 = vshrl.u32 %v354_v52, 7 }
  0x3a   : > { %s1754_s16 = sshll.u32 %s3731_s15, 3  ;;  %474 = vmatprep.subr.bf16.mxu1 %v2123_v19  ;;  %492 = vmatprep.mubr.bf16.mxu1 %v3524_v22  ;;  %v2504_v23 = vld [vmem:[#allocation5 + $0x74] ss:$8 sps:$4 sm:$0xff]   ;;  %v2511_v36 = vld [vmem:[#allocation5 + $0x70] ss:$8 sps:$4 sm:$0xff]   ;;  %v2634_v14 = vld [vmem:[%s3519_s4 + $0xc0] sm:$0xff] }
  0x3b   : > { %s307_s19 = scalar_lea.vmem %s3515_s0, %s1754_s16  ;;  %v2513_v38 = vld [vmem:[#allocation5 + $0x64] ss:$8 sps:$4 sm:$0xff]   ;;  %v2518_v39 = vld [vmem:[#allocation5 + $0x60] ss:$8 sps:$4 sm:$0xff]   ;;  %v2522_v40 = vld [vmem:[#allocation5 + $0x54] ss:$8 sps:$4 sm:$0xff]  }
  0x3c   : > { %v311_v0 = vld [vmem:[%s307_s19] sm:$0xff]  ;;  %v312_v1 = vld [vmem:[%s307_s19 + $0x8] sm:$0xff]  ;;  %432 = vmatpush1.bf16.msra.mxu0 %v2125_v20  ;;  %v2525_v41 = vld [vmem:[#allocation5 + $0x50] ss:$8 sps:$4 sm:$0xff]   ;;  %3623 = vst [vmem:[#allocation15_spill] sm:$0xff] %v2560_v53  ;;  %v356_v54 = vsub.s32 0, %v2560_v53 }
  0x3d   : > { %v314_v2 = vsel %vm313_vm0, %v311_v0, 0.0  ;;  %v317_v3 = vsel %vm313_vm0, %v312_v1, 0.0  ;;  %475 = vmatpush1.bf16.msra.mxu1 %v2126_v21  ;;  %600 = vmatprep.subr.bf16.mxu0 %v2504_v23  ;;  %v2528_v42 = vld [vmem:[#allocation5 + $0x44] ss:$8 sps:$4 sm:$0xff]   ;;  %v2531_v43 = vld [vmem:[#allocation5 + $0x40] ss:$8 sps:$4 sm:$0xff]  }
  0x3e   : > { %315 = vadd.xlane.f32.xlu0 %v314_v2  ;;  %v2534_v44 = vld [vmem:[#allocation5 + $0x34] ss:$8 sps:$4 sm:$0xff]   ;;  %v2537_v45 = vld [vmem:[#allocation5 + $0x30] ss:$8 sps:$4 sm:$0xff]   ;;  %v2540_v46 = vld [vmem:[#allocation5 + $0x24] ss:$8 sps:$4 sm:$0xff]  }
  0x3f   : > { %v2543_v47 = vld [vmem:[#allocation5 + $0x20] ss:$8 sps:$4 sm:$0xff]   ;;  %v2547_v48 = vld [vmem:[#allocation5 + $0x14] ss:$8 sps:$4 sm:$0xff]   ;;  %v2549_v49 = vld [vmem:[#allocation5 + $0x10] ss:$8 sps:$4 sm:$0xff]  }
  0x40   : > { %v2553_v50 = vld [vmem:[#allocation5 + $0x4] ss:$8 sps:$4 sm:$0xff]   ;;  %v2555_v51 = vld [vmem:[#allocation5] ss:$8 sps:$4 sm:$0xff]   ;;  %v360_v63 = vsub.s32 1, %v2560_v53  ;;  %v2641_v15 = vld [vmem:[%s3519_s4 + $0xb8] sm:$0xff] }
  0x41   : > { %v2566_v55 = vld [vmem:[%s3517_s2] sm:$0xf]  ;;  %v2648_v16 = vld [vmem:[%s3519_s4 + $0xb0] sm:$0xff]  ;;  %v2655_v17 = vld [vmem:[%s3519_s4 + $0xa8] sm:$0xff]  ;;  %s300_s17 = sand.u32 1, %s2339_s25   ;;  %s1835_s18 = sshll.u32 %s2420_s28, 8 }
  0x42   : > { %318 = vadd.xlane.f32.xlu0 %v317_v3  ;;  %v357_v57 = vrot.slane %v2566_v55, %v356_v54  ;;  %v2662_v18 = vld [vmem:[%s3519_s4 + $0xa0] sm:$0xff]  ;;  %v2669_v19 = vld [vmem:[%s3519_s4 + $0x98] sm:$0xff]  ;;  %v2676_v20 = vld [vmem:[%s3519_s4 + $0x90] sm:$0xff]  ;;  %s1752_s15 = sshll.u32 %s300_s17, 4  ;;  %vm1643_vm1 = vcmask 64512   ;;  %s3470_s23 = scalar_lea.hbm %s3522_s7, %s1835_s18 }
  0x43   : > { %v2683_v21 = vld [vmem:[%s3519_s4 + $0x88] sm:$0xff]  ;;  %v2774_v54 = vld [vmem:[%s3519_s4 + $0x20] sm:$0xff]  ;;  %s302_s19 = scalar_lea.vmem [#allocation7], %s1752_s15  ;;  %s3475_s28 = scalar_lea.sflag [#allocation4], %s300_s17 }
  0x44   : > { %v2767_v52 = vld [vmem:[%s3519_s4 + $0x28] sm:$0xff]  ;;  %3628 = vst [vmem:[#allocation20_spill] sm:$0xff] %v2774_v54  ;;  %s1660_s20 = sshll.u32 %s302_s19, 4  ;;  %s2356_s8 = smov [#allocation7]   ;;  %s3472_s20 = int_to_ptr.vmem [resolvable:$true] %s1660_s20 }
  0x45   : > { %3627 = vst [vmem:[#allocation19_spill] sm:$0xff] %v2767_v52  ;;  %s2279_s29 = scalar_lea.vmem %s3472_s20, 256  ;;  %s2283_s9 = sshll.u32 %s2356_s8, 4  ;;  %s2284_s9 = int_to_ptr.vmem [resolvable:$false] %s2283_s9 }
  0x46   : > { %p2280_p10 = scmp.ne.s32.totalorder %s3472_s20, %s2279_s29  ;;  %s2285_s14 = scalar_lea.vmem %s2284_s9, 512 }
  0x47   : > { %p2286_p11 = scmp.lt.s32.totalorder %s3472_s20, %s2284_s9  ;;  %p2287_p0 = scmp.lt.s32.totalorder %s2285_s14, %s2279_s29 }
  0x48   : > { %p2281_p12 = pnand %p2280_p10, %p2437_p5 }
  0x49   : > { %p2288_p1 = por %p2287_p0, %p2286_p11 }
  0x4a   : > { %p2282_p8 = pneg %p2281_p12 }
  0x4c   : > { %p2289_p3 = pnand %p2288_p1, %p2282_p8 }
  0xc7   : > { %v316_v4 = vpop.xlane.xlu0 %315 }
  0xc8   : > { %v2494_v5 = vmul.f32 0.03125, %v316_v4 }
  0xca   : > { %3619 = vst [vmem:[#allocation11_spill] sm:$0xff] %v2494_v5  ;;  %v323_v6 = vsub.f32 %v311_v0, %v2494_v5  ;;  %v2879_v5 = vld [vmem:[%s3519_s4 + $0x1a8] sm:$0xff] }
  0xcb   : > { %v319_v7 = vpop.xlane.xlu0 %318  ;;  %3643 = vst [vmem:[#allocation35_spill] sm:$0xff] %v2879_v5 }
  0xcc   : > { %v2497_v8 = vmul.f32 0.03125, %v319_v7  ;;  %v325_v9 = vmul.f32 %v323_v6, %v323_v6  ;;  %v2595_v7 = vld [vmem:[%s3519_s4 + $0xf0] sm:$0xff] }
  0xce   : > { %3620 = vst [vmem:[#allocation12_spill] sm:$0xff] %v2497_v8  ;;  %v324_v10 = vsub.f32 %v312_v1, %v2497_v8  ;;  %v327_v11 = vsel %vm313_vm0, %v325_v9, 0.0  ;;  %v361_v1 = vrot.slane %v2566_v55, %v360_v63  ;;  %v2600_v9 = vld [vmem:[%s3519_s4 + $0xe8] sm:$0xff]  ;;  %v2830_v63 = vld [vmem:[%s3519_s4 + $0x1e0] sm:$0xff]  ;;  %v2893_v8 = vld [vmem:[%s3519_s4 + $0x198] sm:$0xff] }
  0xcf   : > { %328 = vadd.xlane.f32.xlu1 %v327_v11  ;;  %v2613_v11 = vld [vmem:[%s3519_s4 + $0xd8] sm:$0xff]  ;;  %3636 = vst [vmem:[#allocation28_spill] sm:$0xff] %v2830_v63  ;;  %3645 = vst [vmem:[#allocation37_spill] sm:$0xff] %v2893_v8 }
  0xd0   : > { %v326_v12 = vmul.f32 %v324_v10, %v324_v10 }
  0xd2   : > { %v330_v13 = vsel %vm313_vm0, %v326_v12, 0.0  ;;  %v2620_v12 = vld [vmem:[%s3519_s4 + $0xd0] sm:$0xff] }
  0xd3   : > { %331 = vadd.xlane.f32.xlu1 %v330_v13  ;;  %v2627_v13 = vld [vmem:[%s3519_s4 + $0xc8] sm:$0xff] }
 0x158   : > { %v329_v24 = vpop.xlane.xlu1 %328 }
 0x159   : > { %v333_v25 = vmul.f32 0.03125, %v329_v24  ;;  %v2690_v24 = vld [vmem:[%s3519_s4 + $0x80] sm:$0xff] }
 0x15b   : > { %v335_v26 = vadd.f32 1e-05, %v333_v25  ;;  %v2697_v25 = vld [vmem:[%s3519_s4 + $0x78] sm:$0xff] }
 0x15c   : > { %v332_v27 = vpop.xlane.xlu1 %331 }
 0x15d   : > { %2151 = vrsqrt.f32 %v335_v26  ;;  %v334_v28 = vmul.f32 0.03125, %v332_v27  ;;  %v2711_v27 = vld [vmem:[%s3519_s4 + $0x68] sm:$0xff] }
 0x15f   : > { %v336_v29 = vadd.f32 1e-05, %v334_v28  ;;  %v2718_v28 = vld [vmem:[%s3519_s4 + $0x60] sm:$0xff] }
 0x161   : > { %2153 = vrsqrt.f32 %v336_v29 }
 0x16a   : > { %v2152_v30 = vpop.eup %2151 }
 0x16b   : > { %v2507_v31 = vmul.f32 %v2152_v30, %v335_v26  ;;  %v341_v34 = vmul.f32 %v2152_v30, %v323_v6  ;;  %v2590_v6 = vld [vmem:[%s3519_s4 + $0xf8] sm:$0xff]  ;;  %v2704_v26 = vld [vmem:[%s3519_s4 + $0x70] sm:$0xff] }
 0x16c   : > { %729 = vmatprep.subr.mxu1 %v2590_v6  ;;  %v2732_v30 = vld [vmem:[%s3519_s4 + $0x50] sm:$0xff] }
 0x16d   : > { %3621 = vst [vmem:[#allocation13_spill] sm:$0xff] %v2507_v31  ;;  %v2886_v31 = vld [vmem:[%s3519_s4 + $0x1a0] sm:$0xff] }
 0x16e   : > { %v2154_v32 = vpop.eup %2153  ;;  %3644 = vst [vmem:[#allocation36_spill] sm:$0xff] %v2886_v31 }
 0x16f   : > { %v2509_v33 = vmul.f32 %v2154_v32, %v336_v29  ;;  %v342_v35 = vmul.f32 %v2154_v32, %v324_v10  ;;  %v2606_v10 = vld [vmem:[%s3519_s4 + $0xe0] sm:$0xff]  ;;  %v2725_v29 = vld [vmem:[%s3519_s4 + $0x58] sm:$0xff]  ;;  %v2739_v32 = vld [vmem:[%s3519_s4 + $0x48] sm:$0xff] }
 0x171   : > { %3622 = vst [vmem:[#allocation14_spill] sm:$0xff] %v2509_v33  ;;  %v343_v37 = vpack.c.bf16 %v342_v35, %v341_v34  ;;  %v2746_v34 = vld [vmem:[%s3519_s4 + $0x40] sm:$0xff]  ;;  %v2753_v35 = vld [vmem:[%s3519_s4 + $0x38] sm:$0xff]  ;;  %v2900_v33 = vld [vmem:[%s3519_s4 + $0x190] sm:$0xff] }
 0x172   : > { %3624 = vst [vmem:[#allocation16_spill] sm:$0xff] %v2746_v34  ;;  %3625 = vst [vmem:[#allocation17_spill] sm:$0xff] %v2753_v35 }
 0x173   : > { %1763 = vmatmul.mubr.msk.bf16.vlgmr.msra.gmra.mxu0 %vm313_vm0, %v343_v37  ;;  %1764 = vmatmul.mubr.msk.bf16.vlgmr.msra.gmra.mxu1 %vm313_vm0, %v343_v37  ;;  %v2760_v37 = vld [vmem:[%s3519_s4 + $0x30] sm:$0xff]  ;;  %3646 = vst [vmem:[#allocation38_spill] sm:$0xff] %v2900_v33 }
 0x174   : > { %601 = vmatpush1.bf16.msra.mxu0 %v2511_v36  ;;  %632 = vmatprep.mubr.bf16.mxu0 %v3524_v22  ;;  %3626 = vst [vmem:[#allocation18_spill] sm:$0xff] %v2760_v37 }
 0x175   : > { %602 = vmatprep.subr.bf16.mxu0 %v2513_v38  ;;  %730 = vmatpush1.msra.mxu1 %v2595_v7 }
 0x176   : > { %731 = vmatprep.subr.mxu1 %v2600_v9 }
 0x177   : > { %732 = vmatpush1.msra.mxu1 %v2606_v10 }
 0x178   : > { %603 = vmatpush1.bf16.msra.mxu0 %v2518_v39  ;;  %733 = vmatprep.subr.mxu1 %v2613_v11 }
 0x179   : > { %604 = vmatprep.subr.bf16.mxu0 %v2522_v40  ;;  %734 = vmatpush1.msra.mxu1 %v2620_v12 }
 0x17a   : > { %735 = vmatprep.subr.mxu1 %v2627_v13 }
 0x17b   : > { %736 = vmatpush1.msra.mxu1 %v2634_v14 }
 0x17c   : > { %605 = vmatpush1.bf16.msra.mxu0 %v2525_v41  ;;  %737 = vmatprep.subr.mxu1 %v2641_v15 }
 0x17d   : > { %606 = vmatprep.subr.bf16.mxu0 %v2528_v42  ;;  %738 = vmatpush1.msra.mxu1 %v2648_v16 }
 0x17e   : > { %739 = vmatprep.subr.mxu1 %v2655_v17 }
 0x17f   : > { %740 = vmatpush1.msra.mxu1 %v2662_v18 }
 0x180   : > { %607 = vmatpush1.bf16.msra.mxu0 %v2531_v43  ;;  %741 = vmatprep.subr.mxu1 %v2669_v19 }
 0x181   : > { %608 = vmatprep.subr.bf16.mxu0 %v2534_v44  ;;  %742 = vmatpush1.msra.mxu1 %v2676_v20 }
 0x182   : > { %743 = vmatprep.subr.mxu1 %v2683_v21 }
 0x183   : > { %744 = vmatpush1.msra.mxu1 %v2690_v24 }
 0x184   : > { %609 = vmatpush1.bf16.msra.mxu0 %v2537_v45  ;;  %745 = vmatprep.subr.mxu1 %v2697_v25 }
 0x185   : > { %610 = vmatprep.subr.bf16.mxu0 %v2540_v46  ;;  %746 = vmatpush1.msra.mxu1 %v2704_v26 }
 0x186   : > { %747 = vmatprep.subr.mxu1 %v2711_v27 }
 0x187   : > { %748 = vmatpush1.msra.mxu1 %v2718_v28 }
 0x188   : > { %611 = vmatpush1.bf16.msra.mxu0 %v2543_v47  ;;  %749 = vmatprep.subr.mxu1 %v2725_v29 }
 0x189   : > { %612 = vmatprep.subr.bf16.mxu0 %v2547_v48  ;;  %750 = vmatpush1.msra.mxu1 %v2732_v30 }
 0x18a   : > { %751 = vmatprep.subr.mxu1 %v2739_v32 }
 0x18b   : > { %752 = vmatpush1.msra.mxu1 %v2746_v34 }
 0x18c   : > { %613 = vmatpush1.bf16.msra.mxu0 %v2549_v49  ;;  %753 = vmatprep.subr.mxu1 %v2753_v35 }
 0x18d   : > { %614 = vmatprep.subr.bf16.mxu0 %v2553_v50  ;;  %754 = vmatpush1.msra.mxu1 %v2760_v37 }
 0x18e   : > { %755 = vmatprep.subr.mxu1 %v2767_v52 }
 0x18f   : > { %756 = vmatpush1.msra.mxu1 %v2774_v54 }
 0x190   : > { %615 = vmatpush1.bf16.msra.mxu0 %v2555_v51 }
 0x191   : > { %829 = vmatprep.subr.bf16.mxu0 %v2504_v23 }
 0x233   : > { %v451_v56 = vpop.f32.mrf.mxu0 }
 0x234   : > { %v452_v60 = vadd.f32 %v451_v56, %v357_v57  ;;  %v2781_v56 = vld [vmem:[%s3519_s4 + $0x18] sm:$0xff] }
 0x235   : > { %v453_v58 = vpop.f32.mrf.mxu0  ;;  %3629 = vst [vmem:[#allocation21_spill] sm:$0xff] %v2781_v56  ;;  %757 = vmatprep.subr.mxu1 %v2781_v56 }
 0x236   : > { %v454_v3 = vadd.f32 %v453_v58, %v361_v1  ;;  %v2795_v58 = vld [vmem:[%s3519_s4 + $0x8] sm:$0xff] }
 0x237   : > { %v455_v59 = vpop.f32.mrf.mxu0  ;;  %3631 = vst [vmem:[#allocation23_spill] sm:$0xff] %v2795_v58 }
 0x238   : > { %v456_v61 = vadd.f32 %v455_v59, %v357_v57  ;;  %v2788_v57 = vld [vmem:[%s3519_s4 + $0x10] sm:$0xff]  ;;  %v2802_v59 = vld [vmem:[%s3519_s4] sm:$0xff] }
 0x239   : > { %v457_v0 = vpop.f32.mrf.mxu0  ;;  %3630 = vst [vmem:[#allocation22_spill] sm:$0xff] %v2788_v57  ;;  %3632 = vst [vmem:[#allocation24_spill] sm:$0xff] %v2802_v59  ;;  %758 = vmatpush1.msra.mxu1 %v2788_v57 }
 0x23a   : > { %v503_v62 = vpack.c.bf16 %v456_v61, %v452_v60  ;;  %v458_v2 = vadd.f32 %v457_v0, %v361_v1  ;;  %v2809_v60 = vld [vmem:[%s3519_s4 + $0x1f8] sm:$0xff]  ;;  %v2816_v61 = vld [vmem:[%s3519_s4 + $0x1f0] sm:$0xff]  ;;  %759 = vmatprep.subr.mxu1 %v2795_v58 }
 0x23b   : > { %3633 = vst [vmem:[#allocation25_spill] sm:$0xff] %v2809_v60  ;;  %3634 = vst [vmem:[#allocation26_spill] sm:$0xff] %v2816_v61  ;;  %760 = vmatpush1.msra.mxu1 %v2802_v59  ;;  %v2837_v0 = vld [vmem:[%s3519_s4 + $0x1d8] sm:$0xff]  ;;  %v2844_v1 = vld [vmem:[%s3519_s4 + $0x1d0] sm:$0xff] }
 0x23c   : > { %633 = vmatmul.mubr.bf16.vlgmr.msra.gmra.mxu0 %v503_v62  ;;  %v828_v4 = vpack.c.bf16 %v458_v2, %v454_v3  ;;  %v2823_v62 = vld [vmem:[%s3519_s4 + $0x1e8] sm:$0xff]  ;;  %761 = vmatprep.subr.mxu1 %v2809_v60  ;;  %3637 = vst [vmem:[#allocation29_spill] sm:$0xff] %v2837_v0  ;;  %3638 = vst [vmem:[#allocation30_spill] sm:$0xff] %v2844_v1  ;;  %v2858_v3 = vld [vmem:[%s3519_s4 + $0x1c0] sm:$0xff] }
 0x23d   : > { %830 = vmatpush1.bf16.msra.mxu0 %v2511_v36  ;;  %861 = vmatprep.mubr.bf16.mxu0 %v3524_v22  ;;  %3635 = vst [vmem:[#allocation27_spill] sm:$0xff] %v2823_v62  ;;  %v2851_v2 = vld [vmem:[%s3519_s4 + $0x1c8] sm:$0xff]  ;;  %3640 = vst [vmem:[#allocation32_spill] sm:$0xff] %v2858_v3  ;;  %v2872_v22 = vld [vmem:[%s3519_s4 + $0x1b0] sm:$0xff] }
 0x23e   : > { %831 = vmatprep.subr.bf16.mxu0 %v2513_v38  ;;  %762 = vmatpush2.msra.mxu1 %v2816_v61  ;;  %3639 = vst [vmem:[#allocation31_spill] sm:$0xff] %v2851_v2  ;;  %3642 = vst [vmem:[#allocation34_spill] sm:$0xff] %v2872_v22 }
 0x23f   : > { %763 = vmatprep.subr.mxu1 %v2823_v62 }
 0x240   : > { %764 = vmatpush2.msra.mxu1 %v2830_v63 }
 0x241   : > { %832 = vmatpush1.bf16.msra.mxu0 %v2518_v39  ;;  %765 = vmatprep.subr.mxu1 %v2837_v0 }
 0x242   : > { %833 = vmatprep.subr.bf16.mxu0 %v2522_v40  ;;  %766 = vmatpush2.msra.mxu1 %v2844_v1 }
 0x243   : > { %767 = vmatprep.subr.mxu1 %v2851_v2 }
 0x244   : > { %768 = vmatpush2.msra.mxu1 %v2858_v3 }
 0x245   : > { %834 = vmatpush1.bf16.msra.mxu0 %v2525_v41 }
 0x246   : > { %835 = vmatprep.subr.bf16.mxu0 %v2528_v42 }
 0x249   : > { %836 = vmatpush1.bf16.msra.mxu0 %v2531_v43 }
 0x24a   : > { %837 = vmatprep.subr.bf16.mxu0 %v2534_v44 }
 0x24d   : > { %838 = vmatpush1.bf16.msra.mxu0 %v2537_v45 }
 0x24e   : > { %839 = vmatprep.subr.bf16.mxu0 %v2540_v46 }
 0x251   : > { %840 = vmatpush1.bf16.msra.mxu0 %v2543_v47 }
 0x252   : > { %841 = vmatprep.subr.bf16.mxu0 %v2547_v48 }
 0x255   : > { %842 = vmatpush1.bf16.msra.mxu0 %v2549_v49 }
 0x256   : > { %843 = vmatprep.subr.bf16.mxu0 %v2553_v50 }
 0x259   : > { %844 = vmatpush1.bf16.msra.mxu0 %v2555_v51 }
 0x25a   : > { %894 = vmatprep.subr.mxu0 %v2590_v6 }
 0x25c   : > { %862 = vmatmul.mubr.bf16.vlgmr.msra.gmra.mxu0 %v828_v4  ;;  %v2865_v4 = vld [vmem:[%s3519_s4 + $0x1b8] sm:$0xff] }
 0x25d   : > { %895 = vmatpush1.msra.mxu0 %v2595_v7  ;;  %3641 = vst [vmem:[#allocation33_spill] sm:$0xff] %v2865_v4  ;;  %769 = vmatprep.subr.mxu1 %v2865_v4 }
 0x25e   : > { %896 = vmatprep.subr.mxu0 %v2600_v9  ;;  %770 = vmatpush2.msra.mxu1 %v2872_v22 }
 0x25f   : > { %897 = vmatpush1.msra.mxu0 %v2606_v10  ;;  %771 = vmatprep.subr.mxu1 %v2879_v5 }
 0x260   : > { %898 = vmatprep.subr.mxu0 %v2613_v11  ;;  %772 = vmatpush2.msra.mxu1 %v2886_v31 }
 0x261   : > { %899 = vmatpush1.msra.mxu0 %v2620_v12  ;;  %773 = vmatprep.subr.mxu1 %v2893_v8 }
 0x262   : > { %900 = vmatprep.subr.mxu0 %v2627_v13  ;;  %774 = vmatpush2.msra.mxu1 %v2900_v33 }
 0x263   : > { %901 = vmatpush1.msra.mxu0 %v2634_v14 }
 0x264   : > { %902 = vmatprep.subr.mxu0 %v2641_v15 }
 0x265   : > { %903 = vmatpush1.msra.mxu0 %v2648_v16 }
 0x266   : > { %904 = vmatprep.subr.mxu0 %v2655_v17 }
 0x267   : > { %905 = vmatpush1.msra.mxu0 %v2662_v18 }
 0x268   : > { %906 = vmatprep.subr.mxu0 %v2669_v19 }
 0x269   : > { %907 = vmatpush1.msra.mxu0 %v2676_v20 }
 0x26a   : > { %908 = vmatprep.subr.mxu0 %v2683_v21 }
 0x26b   : > { %909 = vmatpush1.msra.mxu0 %v2690_v24 }
 0x26c   : > { %910 = vmatprep.subr.mxu0 %v2697_v25 }
 0x26d   : > { %911 = vmatpush1.msra.mxu0 %v2704_v26 }
 0x26e   : > { %912 = vmatprep.subr.mxu0 %v2711_v27 }
 0x26f   : > { %913 = vmatpush1.msra.mxu0 %v2718_v28 }
 0x270   : > { %914 = vmatprep.subr.mxu0 %v2725_v29 }
 0x271   : > { %915 = vmatpush1.msra.mxu0 %v2732_v30 }
 0x272   : > { %916 = vmatprep.subr.mxu0 %v2739_v32 }
 0x273   : > { %917 = vmatpush1.msra.mxu0 %v2746_v34 }
 0x274   : > { %918 = vmatprep.subr.mxu0 %v2753_v35 }
 0x275   : > { %919 = vmatpush1.msra.mxu0 %v2760_v37 }
 0x276   : > { %920 = vmatprep.subr.mxu0 %v2767_v52 }
 0x277   : > { %921 = vmatpush1.msra.mxu0 %v2774_v54 }
 0x278   : > { %922 = vmatprep.subr.mxu0 %v2781_v56 }
 0x279   : > { %923 = vmatpush1.msra.mxu0 %v2788_v57 }
 0x27a   : > { %924 = vmatprep.subr.mxu0 %v2795_v58 }
 0x27b   : > { %925 = vmatpush1.msra.mxu0 %v2802_v59 }
 0x27c   : > { %926 = vmatprep.subr.mxu0 %v2809_v60 }
 0x27d   : > { %927 = vmatpush2.msra.mxu0 %v2816_v61 }
 0x27e   : > { %928 = vmatprep.subr.mxu0 %v2823_v62 }
 0x27f   : > { %929 = vmatpush2.msra.mxu0 %v2830_v63 }
 0x280   : > { %930 = vmatprep.subr.mxu0 %v2837_v0 }
 0x281   : > { %931 = vmatpush2.msra.mxu0 %v2844_v1 }
 0x282   : > { %932 = vmatprep.subr.mxu0 %v2851_v2 }
 0x283   : > { %933 = vmatpush2.msra.mxu0 %v2858_v3 }
 0x284   : > { %934 = vmatprep.subr.mxu0 %v2865_v4 }
 0x285   : > { %935 = vmatpush2.msra.mxu0 %v2872_v22 }
 0x286   : > { %936 = vmatprep.subr.mxu0 %v2879_v5 }
 0x287   : > { %937 = vmatpush2.msra.mxu0 %v2886_v31 }
 0x288   : > { %938 = vmatprep.subr.mxu0 %v2893_v8 }
 0x289   : > { %939 = vmatpush2.msra.mxu0 %v2900_v33 }
 0x2fc   : > { %v634_v22 = vpop.f32.mrf.mxu0 }
 0x2fd   : > { %v2917_v60 = vmul.f32 0.17677669, %v634_v22 }
 0x2fe   : > { %v636_v4 = vpop.f32.mrf.mxu0 }
 0x2ff   : > { %v2913_v31 = vmul.f32 0.17677669, %v636_v4 }
 0x300   : > { %v638_v3 = vpop.f32.mrf.mxu0 }
 0x301   : > { %v2929_v4 = vmul.f32 0.17677669, %v638_v3  ;;  %v2964_v3 = vld [vmem:[%s3519_s4 + $0x168] sm:$0xff] }
 0x302   : > { %v640_v2 = vpop.f32.mrf.mxu0  ;;  %3651 = vst [vmem:[#allocation43_spill] sm:$0xff] %v2964_v3 }
 0x303   : > { %v2923_v58 = vmul.f32 0.17677669, %v640_v2  ;;  %v2956_v2 = vld [vmem:[%s3519_s4 + $0x170] sm:$0xff] }
 0x304   : > { %3650 = vst [vmem:[#allocation42_spill] sm:$0xff] %v2956_v2 }
 0x305   : > { %v650_v22 = vmax.f32 %v2929_v4, %v2923_v58 }
 0x31c   : > { %v863_v1 = vpop.f32.mrf.mxu0 }
 0x31d   : > { %v2909_v63 = vmul.f32 0.17677669, %v863_v1 }
 0x31e   : > { %v865_v0 = vpop.f32.mrf.mxu0 }
 0x31f   : > { %v2911_v5 = vmul.f32 0.17677669, %v865_v0  ;;  %v647_v0 = vmax.f32 %v2917_v60, %v2913_v31 }
 0x320   : > { %v867_v62 = vpop.f32.mrf.mxu0 }
 0x321   : > { %v876_v8 = vmax.f32 %v2909_v63, %v2911_v5  ;;  %v2919_v33 = vmul.f32 0.17677669, %v867_v62  ;;  %v2949_v62 = vld [vmem:[%s3519_s4 + $0x178] sm:$0xff] }
 0x322   : > { %v869_v61 = vpop.f32.mrf.mxu0  ;;  %3649 = vst [vmem:[#allocation41_spill] sm:$0xff] %v2949_v62 }
 0x323   : > { %v2921_v59 = vmul.f32 0.17677669, %v869_v61  ;;  %877 = vmax.xlane.f32.xlu0 %v876_v8  ;;  %v2936_v8 = vld [vmem:[%s3519_s4 + $0x188] sm:$0xff]  ;;  %v2942_v61 = vld [vmem:[%s3519_s4 + $0x180] sm:$0xff] }
 0x324   : > { %3647 = vst [vmem:[#allocation39_spill] sm:$0xff] %v2936_v8  ;;  %940 = vmatprep.subr.mxu0 %v2936_v8  ;;  %3648 = vst [vmem:[#allocation40_spill] sm:$0xff] %v2942_v61  ;;  %775 = vmatprep.subr.mxu1 %v2936_v8 }
 0x325   : > { %v879_v1 = vmax.f32 %v2919_v33, %v2921_v59  ;;  %941 = vmatpush2.msra.mxu0 %v2942_v61  ;;  %776 = vmatpush2.msra.mxu1 %v2942_v61 }
 0x326   : > { %942 = vmatprep.subr.mxu0 %v2949_v62  ;;  %777 = vmatprep.subr.mxu1 %v2949_v62  ;;  %v3036_v62 = vld [vmem:[%s3519_s4 + $0x110] sm:$0xff] }
 0x327   : > { %648 = vmax.xlane.f32.xlu0 %v647_v0  ;;  %880 = vmax.xlane.f32.xlu1 %v879_v1  ;;  %v2970_v0 = vld [vmem:[%s3519_s4 + $0x160] sm:$0xff]  ;;  %v2977_v1 = vld [vmem:[%s3519_s4 + $0x158] sm:$0xff]  ;;  %3662 = vst [vmem:[#allocation54_spill] sm:$0xff] %v3036_v62 }
 0x328   : > { %943 = vmatpush2.msra.mxu0 %v2956_v2  ;;  %778 = vmatpush2.msra.mxu1 %v2956_v2  ;;  %3652 = vst [vmem:[#allocation44_spill] sm:$0xff] %v2970_v0  ;;  %3653 = vst [vmem:[#allocation45_spill] sm:$0xff] %v2977_v1  ;;  %v3022_v2 = vld [vmem:[%s3519_s4 + $0x120] sm:$0xff] }
 0x329   : > { %944 = vmatprep.subr.mxu0 %v2964_v3  ;;  %779 = vmatprep.subr.mxu1 %v2964_v3  ;;  %v2991_v3 = vld [vmem:[%s3519_s4 + $0x148] sm:$0xff]  ;;  %3660 = vst [vmem:[#allocation52_spill] sm:$0xff] %v3022_v2 }
 0x32a   : > { %945 = vmatpush2.msra.mxu0 %v2970_v0  ;;  %780 = vmatpush2.msra.mxu1 %v2970_v0  ;;  %3655 = vst [vmem:[#allocation47_spill] sm:$0xff] %v2991_v3  ;;  %v2998_v0 = vld [vmem:[%s3519_s4 + $0x140] sm:$0xff] }
 0x32b   : > { %651 = vmax.xlane.f32.xlu1 %v650_v22  ;;  %946 = vmatprep.subr.mxu0 %v2977_v1  ;;  %v2984_v22 = vld [vmem:[%s3519_s4 + $0x150] sm:$0xff]  ;;  %3656 = vst [vmem:[#allocation48_spill] sm:$0xff] %v2998_v0 }
 0x32c   : > { %3654 = vst [vmem:[#allocation46_spill] sm:$0xff] %v2984_v22  ;;  %781 = vmatprep.subr.mxu1 %v2977_v1  ;;  %947 = vmatpush2.msra.mxu0 %v2984_v22  ;;  %v3005_v1 = vld [vmem:[%s3519_s4 + $0x138] sm:$0xff] }
 0x32d   : > { %782 = vmatpush2.msra.mxu1 %v2984_v22  ;;  %948 = vmatprep.subr.mxu0 %v2991_v3  ;;  %3657 = vst [vmem:[#allocation49_spill] sm:$0xff] %v3005_v1  ;;  %v3012_v22 = vld [vmem:[%s3519_s4 + $0x130] sm:$0xff] }
 0x32e   : > { %783 = vmatprep.subr.mxu1 %v2991_v3  ;;  %949 = vmatpush2.msra.mxu0 %v2998_v0  ;;  %3658 = vst [vmem:[#allocation50_spill] sm:$0xff] %v3012_v22  ;;  %v3017_v3 = vld [vmem:[%s3519_s4 + $0x128] sm:$0xff] }
 0x32f   : > { %784 = vmatpush2.msra.mxu1 %v2998_v0  ;;  %950 = vmatprep.subr.mxu0 %v3005_v1  ;;  %3659 = vst [vmem:[#allocation51_spill] sm:$0xff] %v3017_v3  ;;  %v3029_v0 = vld [vmem:[%s3519_s4 + $0x118] sm:$0xff] }
 0x330   : > { %785 = vmatprep.subr.mxu1 %v3005_v1  ;;  %951 = vmatpush2.msra.mxu0 %v3012_v22  ;;  %3661 = vst [vmem:[#allocation53_spill] sm:$0xff] %v3029_v0  ;;  %v3043_v1 = vld [vmem:[%s3519_s4 + $0x108] sm:$0xff] }
 0x331   : > { %786 = vmatpush2.msra.mxu1 %v3012_v22  ;;  %952 = vmatprep.subr.mxu0 %v3017_v3  ;;  %3663 = vst [vmem:[#allocation55_spill] sm:$0xff] %v3043_v1  ;;  %v3050_v22 = vld [vmem:[%s3519_s4 + $0x100] sm:$0xff] }
 0x332   : > { %787 = vmatprep.subr.mxu1 %v3017_v3  ;;  %953 = vmatpush2.msra.mxu0 %v3022_v2  ;;  %3664 = vst [vmem:[#allocation56_spill] sm:$0xff] %v3050_v22 }
 0x333   : > { %788 = vmatpush2.msra.mxu1 %v3022_v2  ;;  %954 = vmatprep.subr.mxu0 %v3029_v0  ;;  %v1796_v2 = vld [vmem:[%s3520_s5 + $0xf8] sm:$0xff] }
 0x334   : > { %789 = vmatprep.subr.mxu1 %v3029_v0  ;;  %955 = vmatpush2.msra.mxu0 %v3036_v62 }
 0x335   : > { %790 = vmatpush2.msra.mxu1 %v3036_v62  ;;  %956 = vmatprep.subr.mxu0 %v3043_v1 }
 0x336   : > { %791 = vmatprep.subr.mxu1 %v3043_v1  ;;  %957 = vmatpush2.msra.mxu0 %v3050_v22 }
 0x337   : > { %792 = vmatpush2.msra.mxu1 %v3050_v22  ;;  %1145 = vmatprep.subr.bf16.mxu0 %v2504_v23 }
 0x338   : > { %1908 = vmatprep.subr.mxu1 %v1796_v2 }
 0x3ac   : > { %v878_v0 = vpop.xlane.xlu0 %877 }
 0x3ad   : > { %v882_v3 = vsub.f32 %v2909_v63, %v878_v0  ;;  %v883_v62 = vsub.f32 %v2911_v5, %v878_v0  ;;  %v1781_v0 = vld [vmem:[%s3520_s5 + $0x80] sm:$0xff] }
 0x3af   : > { %v886_v61 = vmul.f32 1.442695, %v882_v3  ;;  %v888_v8 = vmul.f32 1.442695, %v883_v62  ;;  %v1782_v3 = vld [vmem:[%s3520_s5 + $0x88] sm:$0xff] }
 0x3b0   : > { %v649_v57 = vpop.xlane.xlu0 %648  ;;  %v881_v1 = vpop.xlane.xlu1 %880 }
 0x3b1   : > { %2155 = vpow2.f32 %v886_v61  ;;  %v653_v56 = vsub.f32 %v2917_v60, %v649_v57  ;;  %v654_v22 = vsub.f32 %v2913_v31, %v649_v57  ;;  %v884_v23 = vsub.f32 %v2919_v33, %v881_v1 }
 0x3b2   : > { %2157 = vpow2.f32 %v888_v8  ;;  %v885_v54 = vsub.f32 %v2921_v59, %v881_v1  ;;  %v3665_v57 = vmov 0   ;;  %v1784_v8 = vld [vmem:[%s3520_s5 + $0x98] sm:$0xff] }
 0x3b3   : > { %v657_v52 = vmul.f32 1.442695, %v653_v56  ;;  %v659_v37 = vmul.f32 1.442695, %v654_v22  ;;  %v890_v35 = vmul.f32 1.442695, %v884_v23 }
 0x3b4   : > { %v892_v63 = vmul.f32 1.442695, %v885_v54  ;;  %v652_v34 = vpop.xlane.xlu1 %651  ;;  %v827_v1 = vld [vmem:[%s3520_s5 + $0x78] sm:$0xff] }
 0x3b5   : > { %2159 = vpow2.f32 %v657_v52  ;;  %v655_v5 = vsub.f32 %v2929_v4, %v652_v34  ;;  %v656_v62 = vsub.f32 %v2923_v58, %v652_v34  ;;  %v1785_v4 = vld [vmem:[%s3520_s5 + $0xa0] sm:$0xff] }
 0x3b6   : > { %2161 = vpow2.f32 %v659_v37 }
 0x3b7   : > { %2163 = vpow2.f32 %v890_v35  ;;  %v661_v60 = vmul.f32 1.442695, %v655_v5  ;;  %v663_v61 = vmul.f32 1.442695, %v656_v62 }
 0x3b8   : > { %2165 = vpow2.f32 %v892_v63 }
 0x3b9   : > { %2167 = vpow2.f32 %v661_v60 }
 0x3ba   : > { %2169 = vpow2.f32 %v663_v61 }
 0x3be   : > { %v2156_v31 = vpop.eup %2155 }
 0x3bf   : > { %v2158_v33 = vpop.eup %2157 }
 0x3c0   : > { %958 = vmatprep.mubr.f32.mxu0 %v2158_v33 }
 0x3c1   : > { %959 = vmatmul.mubr.f32.vlgmr.msra.gmra.mxu0 %v2156_v31 }
 0x3c2   : > { %v2160_v56 = vpop.eup %2159  ;;  %1146 = vmatpush1.bf16.msra.mxu0 %v2511_v36  ;;  %v1795_v36 = vld [vmem:[%s3520_s5 + $0xf0] sm:$0xff] }
 0x3c3   : > { %v2162_v54 = vpop.eup %2161  ;;  %1147 = vmatprep.subr.bf16.mxu0 %v2513_v38  ;;  %v1794_v38 = vld [vmem:[%s3520_s5 + $0xe8] sm:$0xff] }
 0x3c4   : > { %v2164_v52 = vpop.eup %2163  ;;  %793 = vmatprep.mubr.f32.mxu1 %v2162_v54 }
 0x3c5   : > { %v2166_v34 = vpop.eup %2165  ;;  %794 = vmatmul.mubr.f32.vlgmr.msra.gmra.mxu1 %v2160_v56 }
 0x3c6   : > { %v2168_v35 = vpop.eup %2167  ;;  %964 = vmatprep.mubr.f32.mxu0 %v2166_v34  ;;  %1148 = vmatpush1.bf16.msra.mxu0 %v2518_v39  ;;  %v1793_v39 = vld [vmem:[%s3520_s5 + $0xe0] sm:$0xff] }
 0x3c7   : > { %v2170_v37 = vpop.eup %2169  ;;  %965 = vmatmul.mubr.f32.gmra.mxu0 %v2164_v52  ;;  %1149 = vmatprep.subr.bf16.mxu0 %v2522_v40  ;;  %v494_v40 = vpop.f32.mrf.mxu1 }
 0x3c8   : > { %799 = vmatprep.mubr.f32.mxu1 %v2170_v37  ;;  %1177 = vmatprep.mubr.bf16.mxu0 %v3665_v57  ;;  %v1810_v57 = vld [vmem:[%s3520_s5 + $0x168] sm:$0xff] }
 0x3c9   : > { %800 = vmatmul.mubr.f32.gmra.mxu1 %v2168_v35 }
 0x3ca   : > { %1150 = vmatpush1.bf16.msra.mxu0 %v2525_v41  ;;  %1909 = vmatpush3.msra.mxu1 %v1796_v2  ;;  %v3091_v41 = vpop.f32.mrf.mxu1  ;;  %v1783_v2 = vld [vmem:[%s3520_s5 + $0x90] sm:$0xff] }
 0x3cb   : > { %1151 = vmatprep.subr.bf16.mxu0 %v2528_v42  ;;  %1910 = vmatprep.subr.mxu1 %v1795_v36  ;;  %3666 = vst [vmem:[#allocation57_spill] sm:$0xff] %v3091_v41  ;;  %v364_v42 = vsub.s32 2, %v2560_v53  ;;  %v3708_v41 = vld [vmem:[#allocation56_spill] sm:$0xff]  ;;  %v1811_v53 = vld [vmem:[%s3520_s5 + $0x170] sm:$0xff] }
 0x3cc   : > { %1911 = vmatpush3.msra.mxu1 %v1795_v36  ;;  %v498_v58 = vpop.f32.mrf.mxu1 }
 0x3cd   : > { %1912 = vmatprep.subr.mxu1 %v1794_v38 }
 0x3ce   : > { %1152 = vmatpush1.bf16.msra.mxu0 %v2531_v43  ;;  %1913 = vmatpush3.msra.mxu1 %v1794_v38  ;;  %v365_v43 = vrot.slane %v2566_v55, %v364_v42  ;;  %v1786_v55 = vld [vmem:[%s3520_s5 + $0xa8] sm:$0xff]  ;;  %v3139_v23 = vpop.f32.mrf.mxu1  ;;  %v826_v38 = vld [vmem:[%s3520_s5 + $0x70] sm:$0xff]  ;;  %v824_v42 = vld [vmem:[%s3520_s5 + $0x60] sm:$0xff] }
 0x3cf   : > { %1153 = vmatprep.subr.bf16.mxu0 %v2534_v44  ;;  %1914 = vmatprep.subr.mxu1 %v1793_v39  ;;  %3667 = vst [vmem:[#allocation58_spill] sm:$0xff] %v3139_v23  ;;  %v1812_v23 = vld [vmem:[%s3520_s5 + $0x178] sm:$0xff] }
 0x3d0   : > { %1915 = vmatpush3.msra.mxu1 %v1793_v39  ;;  %v499_v44 = vadd.f32 %v498_v58, %v365_v43  ;;  %v495_v59 = vadd.f32 %v494_v40, %v365_v43  ;;  %v825_v39 = vld [vmem:[%s3520_s5 + $0x68] sm:$0xff]  ;;  %v823_v43 = vld [vmem:[%s3520_s5 + $0x58] sm:$0xff] }
 0x3d2   : > { %1154 = vmatpush1.bf16.msra.mxu0 %v2537_v45  ;;  %v1144_v45 = vpack.c.bf16 %v499_v44, %v495_v59 }
 0x3d3   : > { %1155 = vmatprep.subr.bf16.mxu0 %v2540_v46  ;;  %v1792_v46 = vld [vmem:[%s3520_s5 + $0xd8] sm:$0xff] }
 0x3d4   : > { %1916 = vmatprep.subr.mxu1 %v1792_v46 }
 0x3d5   : > { %1917 = vmatpush3.msra.mxu1 %v1792_v46 }
 0x3d6   : > { %1156 = vmatpush1.bf16.msra.mxu0 %v2543_v47  ;;  %v1791_v47 = vld [vmem:[%s3520_s5 + $0xd0] sm:$0xff] }
 0x3d7   : > { %1157 = vmatprep.subr.bf16.mxu0 %v2547_v48  ;;  %1918 = vmatprep.subr.mxu1 %v1791_v47  ;;  %v1790_v48 = vld [vmem:[%s3520_s5 + $0xc8] sm:$0xff] }
 0x3d8   : > { %1919 = vmatpush3.msra.mxu1 %v1791_v47 }
 0x3d9   : > { %1920 = vmatprep.subr.mxu1 %v1790_v48 }
 0x3da   : > { %1158 = vmatpush1.bf16.msra.mxu0 %v2549_v49  ;;  %1921 = vmatpush3.msra.mxu1 %v1790_v48  ;;  %v1789_v49 = vld [vmem:[%s3520_s5 + $0xc0] sm:$0xff] }
 0x3db   : > { %1159 = vmatprep.subr.bf16.mxu0 %v2553_v50  ;;  %1922 = vmatprep.subr.mxu1 %v1789_v49  ;;  %v1788_v50 = vld [vmem:[%s3520_s5 + $0xb8] sm:$0xff] }
 0x3dc   : > { %1923 = vmatpush3.msra.mxu1 %v1789_v49  ;;  %v821_v49 = vld [vmem:[%s3520_s5 + $0x48] sm:$0xff] }
 0x3dd   : > { %1924 = vmatprep.subr.mxu1 %v1788_v50 }
 0x3de   : > { %1160 = vmatpush1.bf16.msra.mxu0 %v2555_v51  ;;  %1925 = vmatpush3.msra.mxu1 %v1788_v50  ;;  %v1787_v51 = vld [vmem:[%s3520_s5 + $0xb0] sm:$0xff] }
 0x3df   : > { %1926 = vmatprep.subr.mxu1 %v1787_v51  ;;  %1978 = vmatprep.subr.mxu0 %v1812_v23 }
 0x3e0   : > { %1927 = vmatpush3.msra.mxu1 %v1787_v51 }
 0x3e1   : > { %1178 = vmatmul.mubr.bf16.vlgmr.msra.gmra.mxu0 %v1144_v45  ;;  %1928 = vmatprep.subr.mxu1 %v1786_v55  ;;  %v822_v45 = vld [vmem:[%s3520_s5 + $0x50] sm:$0xff] }
 0x3e2   : > { %1929 = vmatpush3.msra.mxu1 %v1786_v55  ;;  %1979 = vmatpush3.msra.mxu0 %v1812_v23 }
 0x3e3   : > { %1930 = vmatprep.subr.mxu1 %v1785_v4  ;;  %1980 = vmatprep.subr.mxu0 %v1811_v53 }
 0x3e4   : > { %1931 = vmatpush3.msra.mxu1 %v1785_v4  ;;  %v820_v4 = vld [vmem:[%s3520_s5 + $0x40] sm:$0xff]  ;;  %1981 = vmatpush3.msra.mxu0 %v1811_v53 }
 0x3e5   : > { %1932 = vmatprep.subr.mxu1 %v1784_v8  ;;  %1982 = vmatprep.subr.mxu0 %v1810_v57 }
 0x3e6   : > { %1933 = vmatpush3.msra.mxu1 %v1784_v8  ;;  %1983 = vmatpush3.msra.mxu0 %v1810_v57 }
 0x3e7   : > { %1934 = vmatprep.subr.mxu1 %v1783_v2 }
 0x3e8   : > { %1935 = vmatpush3.msra.mxu1 %v1783_v2 }
 0x3e9   : > { %1936 = vmatprep.subr.mxu1 %v1782_v3 }
 0x3ea   : > { %1937 = vmatpush3.msra.mxu1 %v1782_v3  ;;  %v819_v3 = vld [vmem:[%s3520_s5 + $0x38] sm:$0xff] }
 0x3eb   : > { %1938 = vmatprep.subr.mxu1 %v1781_v0 }
 0x3ec   : > { %1939 = vmatpush3.msra.mxu1 %v1781_v0 }
 0x3ed   : > { %1943 = vmatprep.subr.mxu1 %v827_v1 }
 0x481   : > { %v960_v22 = vpop.f32.mrf.mxu0 }
 0x483   : > { %v962_v63 = vpop.f32.mrf.mxu0 }
 0x484   : > { %v971_v5 = vmax.f32 %v962_v63, 1e-30  ;;  %v816_v63 = vld [vmem:[%s3520_s5 + $0x20] sm:$0xff] }
 0x485   : > { %v795_v62 = vpop.f32.mrf.mxu1 }
 0x486   : > { %2171 = vrcp.f32 %v971_v5  ;;  %v815_v5 = vld [vmem:[%s3520_s5 + $0x18] sm:$0xff] }
 0x487   : > { %v966_v60 = vpop.f32.mrf.mxu0  ;;  %v797_v61 = vpop.f32.mrf.mxu1 }
 0x488   : > { %v806_v31 = vmax.f32 %v797_v61, 1e-30 }
 0x489   : > { %v968_v33 = vpop.f32.mrf.mxu0  ;;  %v801_v40 = vpop.f32.mrf.mxu1 }
 0x48a   : > { %2173 = vrcp.f32 %v806_v31  ;;  %v972_v56 = vmax.f32 %v968_v33, 1e-30  ;;  %v812_v31 = vld [vmem:[%s3520_s5] sm:$0xff] }
 0x48b   : > { %v803_v44 = vpop.f32.mrf.mxu1 }
 0x48c   : > { %2175 = vrcp.f32 %v972_v56  ;;  %v807_v50 = vmax.f32 %v803_v44, 1e-30  ;;  %v3675_v56 = vld [vmem:[#allocation23_spill] sm:$0xff]  ;;  %v3688_v44 = vld [vmem:[#allocation36_spill] sm:$0xff] }
 0x48e   : > { %2177 = vrcp.f32 %v807_v50  ;;  %v3693_v50 = vld [vmem:[#allocation41_spill] sm:$0xff] }
 0x493   : > { %v2172_v54 = vpop.eup %2171 }
 0x494   : > { %v975_v52 = vmul.f32 %v2172_v54, %v960_v22  ;;  %v817_v22 = vld [vmem:[%s3520_s5 + $0x28] sm:$0xff] }
 0x495   : > { %v3676_v54 = vld [vmem:[#allocation24_spill] sm:$0xff] }
 0x496   : > { %1940 = vmatprep.mubr.f32.mxu1 %v975_v52  ;;  %v3677_v52 = vld [vmem:[#allocation25_spill] sm:$0xff] }
 0x497   : > { %v2174_v34 = vpop.eup %2173 }
 0x498   : > { %v810_v37 = vmul.f32 %v2174_v34, %v795_v62  ;;  %v814_v62 = vld [vmem:[%s3520_s5 + $0x10] sm:$0xff]  ;;  %v3678_v34 = vld [vmem:[#allocation26_spill] sm:$0xff] }
 0x499   : > { %v2176_v35 = vpop.eup %2175 }
 0x49a   : > { %v976_v36 = vmul.f32 %v2176_v35, %v966_v60  ;;  %v813_v60 = vld [vmem:[%s3520_s5 + $0x8] sm:$0xff]  ;;  %v3679_v35 = vld [vmem:[#allocation27_spill] sm:$0xff] }
 0x49b   : > { %v2178_v61 = vpop.eup %2177 }
 0x49c   : > { %1941 = vmatmul.mubr.f32.vlgmr.msra.gmra.mxu1 %v976_v36  ;;  %v811_v33 = vmul.f32 %v2178_v61, %v801_v40  ;;  %v3681_v36 = vld [vmem:[#allocation29_spill] sm:$0xff]  ;;  %v3684_v40 = vld [vmem:[#allocation32_spill] sm:$0xff] }
 0x49d   : > { %1944 = vmatpush3.msra.mxu1 %v827_v1  ;;  %1975 = vmatprep.mubr.f32.mxu1 %v810_v37  ;;  %v818_v1 = vld [vmem:[%s3520_s5 + $0x30] sm:$0xff]  ;;  %v3680_v37 = vld [vmem:[#allocation28_spill] sm:$0xff] }
 0x49e   : > { %1945 = vmatprep.subr.mxu1 %v826_v38  ;;  %v3705_v61 = vld [vmem:[#allocation53_spill] sm:$0xff] }
 0x49f   : > { %1946 = vmatpush3.msra.mxu1 %v826_v38  ;;  %v3682_v38 = vld [vmem:[#allocation30_spill] sm:$0xff] }
 0x4a0   : > { %1947 = vmatprep.subr.mxu1 %v825_v39 }
 0x4a1   : > { %1948 = vmatpush3.msra.mxu1 %v825_v39  ;;  %v1179_v58 = vpop.f32.mrf.mxu0  ;;  %v3683_v39 = vld [vmem:[#allocation31_spill] sm:$0xff] }
 0x4a2   : > { %1949 = vmatprep.subr.mxu1 %v824_v42  ;;  %v3156_v46 = vmul.f32 0.17677669, %v1179_v58  ;;  %v3686_v58 = vld [vmem:[#allocation34_spill] sm:$0xff] }
 0x4a3   : > { %1950 = vmatpush3.msra.mxu1 %v824_v42  ;;  %v1181_v59 = vpop.f32.mrf.mxu0  ;;  %v3685_v42 = vld [vmem:[#allocation33_spill] sm:$0xff] }
 0x4a4   : > { %1951 = vmatprep.subr.mxu1 %v823_v43  ;;  %v3158_v47 = vmul.f32 0.17677669, %v1181_v59  ;;  %v3689_v59 = vld [vmem:[#allocation37_spill] sm:$0xff] }
 0x4a5   : > { %1952 = vmatpush3.msra.mxu1 %v823_v43  ;;  %v1183_v48 = vpop.f32.mrf.mxu0  ;;  %v3687_v43 = vld [vmem:[#allocation35_spill] sm:$0xff] }
 0x4a6   : > { %1953 = vmatprep.subr.mxu1 %v822_v45  ;;  %v1192_v51 = vmax.f32 %v3156_v46, %v3158_v47  ;;  %v3168_v8 = vmul.f32 0.17677669, %v1183_v48  ;;  %v3691_v48 = vld [vmem:[#allocation39_spill] sm:$0xff] }
 0x4a7   : > { %1954 = vmatpush3.msra.mxu1 %v822_v45  ;;  %v1185_v55 = vpop.f32.mrf.mxu0  ;;  %v3690_v45 = vld [vmem:[#allocation38_spill] sm:$0xff] }
 0x4a8   : > { %1955 = vmatprep.subr.mxu1 %v821_v49  ;;  %v3170_v2 = vmul.f32 0.17677669, %v1185_v55  ;;  %1193 = vmax.xlane.f32.xlu0 %v1192_v51  ;;  %v3694_v51 = vld [vmem:[#allocation42_spill] sm:$0xff]  ;;  %v3695_v55 = vld [vmem:[#allocation43_spill] sm:$0xff] }
 0x4a9   : > { %1956 = vmatpush3.msra.mxu1 %v821_v49  ;;  %v3692_v49 = vld [vmem:[#allocation40_spill] sm:$0xff] }
 0x4aa   : > { %1957 = vmatprep.subr.mxu1 %v820_v4  ;;  %v1195_v0 = vmax.f32 %v3168_v8, %v3170_v2 }
 0x4ab   : > { %1958 = vmatpush3.msra.mxu1 %v820_v4  ;;  %v3696_v4 = vld [vmem:[#allocation44_spill] sm:$0xff] }
 0x4ac   : > { %1959 = vmatprep.subr.mxu1 %v819_v3  ;;  %1196 = vmax.xlane.f32.xlu1 %v1195_v0  ;;  %v3698_v0 = vld [vmem:[#allocation46_spill] sm:$0xff] }
 0x4ad   : > { %1960 = vmatpush3.msra.mxu1 %v819_v3  ;;  %v3697_v3 = vld [vmem:[#allocation45_spill] sm:$0xff] }
 0x4ae   : > { %1961 = vmatprep.subr.mxu1 %v818_v1 }
 0x4af   : > { %1962 = vmatpush3.msra.mxu1 %v818_v1  ;;  %v3699_v1 = vld [vmem:[#allocation47_spill] sm:$0xff] }
 0x4b0   : > { %1963 = vmatprep.subr.mxu1 %v817_v22 }
 0x4b1   : > { %1964 = vmatpush3.msra.mxu1 %v817_v22  ;;  %v3700_v22 = vld [vmem:[#allocation48_spill] sm:$0xff] }
 0x4b2   : > { %1965 = vmatprep.subr.mxu1 %v816_v63 }
 0x4b3   : > { %1966 = vmatpush3.msra.mxu1 %v816_v63  ;;  %v3701_v63 = vld [vmem:[#allocation49_spill] sm:$0xff] }
 0x4b4   : > { %1967 = vmatprep.subr.mxu1 %v815_v5 }
 0x4b5   : > { %1968 = vmatpush3.msra.mxu1 %v815_v5  ;;  %v3702_v5 = vld [vmem:[#allocation50_spill] sm:$0xff] }
 0x4b6   : > { %1969 = vmatprep.subr.mxu1 %v814_v62 }
 0x4b7   : > { %1970 = vmatpush3.msra.mxu1 %v814_v62  ;;  %v3703_v62 = vld [vmem:[#allocation51_spill] sm:$0xff] }
 0x4b8   : > { %1971 = vmatprep.subr.mxu1 %v813_v60 }
 0x4b9   : > { %1972 = vmatpush3.msra.mxu1 %v813_v60  ;;  %v3704_v60 = vld [vmem:[#allocation52_spill] sm:$0xff] }
 0x4ba   : > { %1973 = vmatprep.subr.mxu1 %v812_v31 }
 0x4bb   : > { %1974 = vmatpush3.msra.mxu1 %v812_v31  ;;  %v3706_v31 = vld [vmem:[#allocation54_spill] sm:$0xff] }
 0x4bc   : > { %1976 = vmatmul.mubr.f32.vlgmr.msra.gmra.mxu1 %v811_v33  ;;  %1210 = vmatprep.subr.mxu1 %v2590_v6  ;;  %v3707_v33 = vld [vmem:[#allocation55_spill] sm:$0xff] }
 0x4bd   : > { %1211 = vmatpush1.msra.mxu1 %v2595_v7  ;;  %v3668_v7 = vld [vmem:[#allocation16_spill] sm:$0xff] }
 0x4be   : > { %1212 = vmatprep.subr.mxu1 %v2600_v9  ;;  %v3669_v9 = vld [vmem:[#allocation17_spill] sm:$0xff] }
 0x4bf   : > { %1213 = vmatpush1.msra.mxu1 %v2606_v10  ;;  %v3670_v10 = vld [vmem:[#allocation18_spill] sm:$0xff] }
 0x4c0   : > { %1214 = vmatprep.subr.mxu1 %v2613_v11  ;;  %v3671_v11 = vld [vmem:[#allocation19_spill] sm:$0xff] }
 0x4c1   : > { %1215 = vmatpush1.msra.mxu1 %v2620_v12  ;;  %v3672_v12 = vld [vmem:[#allocation20_spill] sm:$0xff] }
 0x4c2   : > { %1216 = vmatprep.subr.mxu1 %v2627_v13  ;;  %v3673_v13 = vld [vmem:[#allocation21_spill] sm:$0xff] }
 0x4c3   : > { %1217 = vmatpush1.msra.mxu1 %v2634_v14  ;;  %v3674_v14 = vld [vmem:[#allocation22_spill] sm:$0xff] }
 0x4c4   : > { %1218 = vmatprep.subr.mxu1 %v2641_v15 }
 0x4c5   : > { %1219 = vmatpush1.msra.mxu1 %v2648_v16 }
 0x4c6   : > { %1220 = vmatprep.subr.mxu1 %v2655_v17 }
 0x4c7   : > { %1221 = vmatpush1.msra.mxu1 %v2662_v18 }
 0x4c8   : > { %1222 = vmatprep.subr.mxu1 %v2669_v19 }
 0x4c9   : > { %1223 = vmatpush1.msra.mxu1 %v2676_v20 }
 0x4ca   : > { %1224 = vmatprep.subr.mxu1 %v2683_v21 }
 0x4cb   : > { %1225 = vmatpush1.msra.mxu1 %v2690_v24 }
 0x4cc   : > { %1226 = vmatprep.subr.mxu1 %v2697_v25 }
 0x4cd   : > { %1227 = vmatpush1.msra.mxu1 %v2704_v26 }
 0x4ce   : > { %1228 = vmatprep.subr.mxu1 %v2711_v27 }
 0x4cf   : > { %1229 = vmatpush1.msra.mxu1 %v2718_v28 }
 0x4d0   : > { %1230 = vmatprep.subr.mxu1 %v2725_v29 }
 0x4d1   : > { %1231 = vmatpush1.msra.mxu1 %v2732_v30 }
 0x4d2   : > { %1232 = vmatprep.subr.mxu1 %v2739_v32 }
 0x4d3   : > { %1233 = vmatpush1.msra.mxu1 %v3668_v7 }
 0x4d4   : > { %1234 = vmatprep.subr.mxu1 %v3669_v9 }
 0x4d5   : > { %1235 = vmatpush1.msra.mxu1 %v3670_v10 }
 0x4d6   : > { %1236 = vmatprep.subr.mxu1 %v3671_v11 }
 0x4d7   : > { %1237 = vmatpush1.msra.mxu1 %v3672_v12 }
 0x4d8   : > { %1238 = vmatprep.subr.mxu1 %v3673_v13 }
 0x4d9   : > { %1239 = vmatpush1.msra.mxu1 %v3674_v14 }
 0x4da   : > { %1240 = vmatprep.subr.mxu1 %v3675_v56 }
 0x4db   : > { %1241 = vmatpush1.msra.mxu1 %v3676_v54 }
 0x4dc   : > { %1242 = vmatprep.subr.mxu1 %v3677_v52 }
 0x4dd   : > { %1243 = vmatpush2.msra.mxu1 %v3678_v34 }
 0x4de   : > { %1244 = vmatprep.subr.mxu1 %v3679_v35 }
 0x4df   : > { %1245 = vmatpush2.msra.mxu1 %v3680_v37 }
 0x4e0   : > { %1246 = vmatprep.subr.mxu1 %v3681_v36 }
 0x4e1   : > { %1247 = vmatpush2.msra.mxu1 %v3682_v38 }
 0x4e2   : > { %1248 = vmatprep.subr.mxu1 %v3683_v39 }
 0x4e3   : > { %1249 = vmatpush2.msra.mxu1 %v3684_v40 }
 0x4e4   : > { %1250 = vmatprep.subr.mxu1 %v3685_v42 }
 0x4e5   : > { %1251 = vmatpush2.msra.mxu1 %v3686_v58 }
 0x4e6   : > { %1252 = vmatprep.subr.mxu1 %v3687_v43 }
 0x4e7   : > { %1253 = vmatpush2.msra.mxu1 %v3688_v44 }
 0x4e8   : > { %1254 = vmatprep.subr.mxu1 %v3689_v59 }
 0x4e9   : > { %1255 = vmatpush2.msra.mxu1 %v3690_v45 }
 0x4ea   : > { %1256 = vmatprep.subr.mxu1 %v3691_v48 }
 0x4eb   : > { %1257 = vmatpush2.msra.mxu1 %v3692_v49 }
 0x4ec   : > { %1258 = vmatprep.subr.mxu1 %v3693_v50 }
 0x4ed   : > { %1259 = vmatpush2.msra.mxu1 %v3694_v51 }
 0x4ee   : > { %1260 = vmatprep.subr.mxu1 %v3695_v55 }
 0x4ef   : > { %1261 = vmatpush2.msra.mxu1 %v3696_v4 }
 0x4f0   : > { %1262 = vmatprep.subr.mxu1 %v3697_v3 }
 0x4f1   : > { %1263 = vmatpush2.msra.mxu1 %v3698_v0 }
 0x4f2   : > { %1264 = vmatprep.subr.mxu1 %v3699_v1 }
 0x4f3   : > { %1265 = vmatpush2.msra.mxu1 %v3700_v22 }
 0x4f4   : > { %1266 = vmatprep.subr.mxu1 %v3701_v63 }
 0x4f5   : > { %1267 = vmatpush2.msra.mxu1 %v3702_v5 }
 0x4f6   : > { %1268 = vmatprep.subr.mxu1 %v3703_v62 }
 0x4f7   : > { %1269 = vmatpush2.msra.mxu1 %v3704_v60 }
 0x4f8   : > { %1270 = vmatprep.subr.mxu1 %v3705_v61 }
 0x4f9   : > { %1271 = vmatpush2.msra.mxu1 %v3706_v31 }
 0x4fa   : > { %1272 = vmatprep.subr.mxu1 %v3707_v33 }
 0x4fb   : > { %1273 = vmatpush2.msra.mxu1 %v3708_v41 }
 0x4fc   : > { %1453 = vmatprep.subr.mxu1 %v2590_v6  ;;  %v1809_v6 = vld [vmem:[%s3520_s5 + $0x160] sm:$0xff] }
 0x4fd   : > { %1984 = vmatprep.subr.mxu0 %v1809_v6 }
 0x4fe   : > { %1985 = vmatpush3.msra.mxu0 %v1809_v6 }
 0x531   : > { %v1194_v41 = vpop.xlane.xlu0 %1193 }
 0x532   : > { %v1198_v33 = vsub.f32 %v3156_v46, %v1194_v41  ;;  %v1199_v31 = vsub.f32 %v3158_v47, %v1194_v41  ;;  %v2203_v41 = vld [vmem:[%s3519_s4 + $0xf0] sm:$0xff] }
 0x534   : > { %v1202_v23 = vmul.f32 1.442695, %v1198_v33  ;;  %v1204_v61 = vmul.f32 1.442695, %v1199_v31  ;;  %v2221_v31 = vld [vmem:[#allocation5 + $0x20] ss:$8 sps:$4 sm:$0xff]  }
 0x535   : > { %v1197_v60 = vpop.xlane.xlu1 %1196  ;;  %v2222_v33 = vld [vmem:[#allocation5 + $0x14] ss:$8 sps:$4 sm:$0xff]  }
 0x536   : > { %2179 = vpow2.f32 %v1202_v23  ;;  %v1200_v62 = vsub.f32 %v3168_v8, %v1197_v60  ;;  %v1201_v53 = vsub.f32 %v3170_v2, %v1197_v60  ;;  %v2204_v8 = vld [vmem:[%s3519_s4 + $0xe8] sm:$0xff]  ;;  %v2205_v2 = vld [vmem:[%s3519_s4 + $0xe0] sm:$0xff] }
 0x537   : > { %2181 = vpow2.f32 %v1204_v61  ;;  %v2209_v60 = vld [vmem:[%s3519_s4 + $0xc0] sm:$0xff] }
 0x538   : > { %v1206_v5 = vmul.f32 1.442695, %v1200_v62  ;;  %v1208_v63 = vmul.f32 1.442695, %v1201_v53  ;;  %v2208_v62 = vld [vmem:[%s3519_s4 + $0xc8] sm:$0xff] }
 0x539   : > { %v2223_v23 = vld [vmem:[%s3517_s2] sm:$0xf] }
 0x53a   : > { %2183 = vpow2.f32 %v1206_v5  ;;  %v2207_v5 = vld [vmem:[%s3519_s4 + $0xd0] sm:$0xff] }
 0x53b   : > { %2185 = vpow2.f32 %v1208_v63  ;;  %v2206_v63 = vld [vmem:[%s3519_s4 + $0xd8] sm:$0xff] }
 0x543   : > { %v2180_v57 = vpop.eup %2179 }
 0x544   : > { %v2182_v6 = vpop.eup %2181 }
 0x545   : > { %1274 = vmatprep.mubr.f32.mxu1 %v2182_v6  ;;  %v3719_v6 = vld [vmem:[#allocation58_spill] sm:$0xff] }
 0x546   : > { %1275 = vmatmul.mubr.f32.vlgmr.msra.gmra.mxu1 %v2180_v57  ;;  %v2224_v57 = vld [vmem:[#allocation5 + $0x10] ss:$8 sps:$4 sm:$0xff]  }
 0x547   : > { %v2184_v46 = vpop.eup %2183  ;;  %1454 = vmatpush1.msra.mxu1 %v2203_v41  ;;  %v2225_v41 = vld [vmem:[#allocation5 + $0x4] ss:$8 sps:$4 sm:$0xff]  }
 0x548   : > { %v2186_v47 = vpop.eup %2185  ;;  %1455 = vmatprep.subr.mxu1 %v2204_v8 }
 0x549   : > { %1280 = vmatprep.mubr.f32.mxu1 %v2186_v47  ;;  %1456 = vmatpush1.msra.mxu1 %v2205_v2  ;;  %v3720_v47 = vld [vmem:[#allocation57_spill] sm:$0xff]  ;;  %v2226_v2 = vld [vmem:[#allocation5] ss:$8 sps:$4 sm:$0xff]  }
 0x54a   : > { %1281 = vmatmul.mubr.f32.gmra.mxu1 %v2184_v46  ;;  %1457 = vmatprep.subr.mxu1 %v2206_v63 }
 0x54b   : > { %1458 = vmatpush1.msra.mxu1 %v2207_v5 }
 0x54c   : > { %1459 = vmatprep.subr.mxu1 %v2208_v62 }
 0x54d   : > { %1460 = vmatpush1.msra.mxu1 %v2209_v60 }
 0x54e   : > { %1461 = vmatprep.subr.mxu1 %v2641_v15 }
 0x54f   : > { %1462 = vmatpush1.msra.mxu1 %v2648_v16 }
 0x550   : > { %1463 = vmatprep.subr.mxu1 %v2655_v17 }
 0x551   : > { %1464 = vmatpush1.msra.mxu1 %v2662_v18 }
 0x552   : > { %1465 = vmatprep.subr.mxu1 %v2669_v19  ;;  %v3709_v19 = vld [vmem:[#allocation49_spill] sm:$0xff] }
 0x553   : > { %1466 = vmatpush1.msra.mxu1 %v2676_v20  ;;  %v3710_v20 = vld [vmem:[#allocation50_spill] sm:$0xff] }
 0x554   : > { %1467 = vmatprep.subr.mxu1 %v2683_v21  ;;  %v3711_v21 = vld [vmem:[#allocation51_spill] sm:$0xff] }
 0x555   : > { %1468 = vmatpush1.msra.mxu1 %v2690_v24  ;;  %v3712_v24 = vld [vmem:[#allocation52_spill] sm:$0xff] }
 0x556   : > { %1469 = vmatprep.subr.mxu1 %v2697_v25  ;;  %v3713_v25 = vld [vmem:[#allocation53_spill] sm:$0xff] }
 0x557   : > { %1470 = vmatpush1.msra.mxu1 %v2704_v26  ;;  %v3714_v26 = vld [vmem:[#allocation54_spill] sm:$0xff] }
 0x558   : > { %1471 = vmatprep.subr.mxu1 %v2711_v27  ;;  %v3715_v27 = vld [vmem:[#allocation55_spill] sm:$0xff] }
 0x559   : > { %1472 = vmatpush1.msra.mxu1 %v2718_v28  ;;  %v3716_v28 = vld [vmem:[#allocation56_spill] sm:$0xff] }
 0x55a   : > { %1473 = vmatprep.subr.mxu1 %v2725_v29  ;;  %v1808_v29 = vld [vmem:[%s3520_s5 + $0x158] sm:$0xff] }
 0x55b   : > { %1474 = vmatpush1.msra.mxu1 %v2732_v30  ;;  %1986 = vmatprep.subr.mxu0 %v1808_v29  ;;  %v1807_v30 = vld [vmem:[%s3520_s5 + $0x150] sm:$0xff] }
 0x55c   : > { %1475 = vmatprep.subr.mxu1 %v2739_v32  ;;  %v1942_v15 = vpop.f32.mrf.mxu1  ;;  %1987 = vmatpush3.msra.mxu0 %v1808_v29  ;;  %v1806_v32 = vld [vmem:[%s3520_s5 + $0x148] sm:$0xff] }
 0x55d   : > { %1476 = vmatpush1.msra.mxu1 %v3668_v7  ;;  %1988 = vmatprep.subr.mxu0 %v1807_v30  ;;  %v1805_v7 = vld [vmem:[%s3520_s5 + $0x140] sm:$0xff] }
 0x55e   : > { %1477 = vmatprep.subr.mxu1 %v3669_v9  ;;  %v3344_v16 = vpop.f32.mrf.mxu1  ;;  %1989 = vmatpush3.msra.mxu0 %v1807_v30  ;;  %v1804_v9 = vld [vmem:[%s3520_s5 + $0x138] sm:$0xff] }
 0x55f   : > { %1478 = vmatpush1.msra.mxu1 %v3670_v10  ;;  %1990 = vmatprep.subr.mxu0 %v1806_v32  ;;  %v1803_v10 = vld [vmem:[%s3520_s5 + $0x130] sm:$0xff] }
 0x560   : > { %1479 = vmatprep.subr.mxu1 %v3671_v11  ;;  %1991 = vmatpush3.msra.mxu0 %v1806_v32  ;;  %v1802_v11 = vld [vmem:[%s3520_s5 + $0x128] sm:$0xff] }
 0x561   : > { %1480 = vmatpush1.msra.mxu1 %v3672_v12  ;;  %1992 = vmatprep.subr.mxu0 %v1805_v7  ;;  %v1801_v12 = vld [vmem:[%s3520_s5 + $0x120] sm:$0xff]  ;;  %v1826_v32 = vld [vmem:[%s3520_s5 + $0x1e8] sm:$0xff] }
 0x562   : > { %1481 = vmatprep.subr.mxu1 %v3673_v13  ;;  %1993 = vmatpush3.msra.mxu0 %v1805_v7  ;;  %v1800_v13 = vld [vmem:[%s3520_s5 + $0x118] sm:$0xff]  ;;  %v1825_v7 = vld [vmem:[%s3520_s5 + $0x1e0] sm:$0xff] }
 0x563   : > { %1482 = vmatpush1.msra.mxu1 %v3674_v14  ;;  %1994 = vmatprep.subr.mxu0 %v1804_v9  ;;  %v1799_v14 = vld [vmem:[%s3520_s5 + $0x110] sm:$0xff] }
 0x564   : > { %1483 = vmatprep.subr.mxu1 %v3675_v56  ;;  %1995 = vmatpush3.msra.mxu0 %v1804_v9  ;;  %v1798_v56 = vld [vmem:[%s3520_s5 + $0x108] sm:$0xff] }
 0x565   : > { %1484 = vmatpush1.msra.mxu1 %v3676_v54  ;;  %1996 = vmatprep.subr.mxu0 %v1803_v10  ;;  %v1797_v54 = vld [vmem:[%s3520_s5 + $0x100] sm:$0xff] }
 0x566   : > { %1485 = vmatprep.subr.mxu1 %v3677_v52  ;;  %1997 = vmatpush3.msra.mxu0 %v1803_v10  ;;  %v2210_v52 = vld [vmem:[#allocation5 + $0x74] ss:$8 sps:$4 sm:$0xff]  }
 0x567   : > { %1486 = vmatpush2.msra.mxu1 %v3678_v34  ;;  %1998 = vmatprep.subr.mxu0 %v1802_v11 }
 0x568   : > { %1487 = vmatprep.subr.mxu1 %v3679_v35  ;;  %1999 = vmatpush3.msra.mxu0 %v1802_v11 }
 0x569   : > { %1488 = vmatpush2.msra.mxu1 %v3680_v37  ;;  %2000 = vmatprep.subr.mxu0 %v1801_v12 }
 0x56a   : > { %1489 = vmatprep.subr.mxu1 %v3681_v36  ;;  %2001 = vmatpush3.msra.mxu0 %v1801_v12 }
 0x56b   : > { %1490 = vmatpush2.msra.mxu1 %v3682_v38  ;;  %2002 = vmatprep.subr.mxu0 %v1800_v13 }
 0x56c   : > { %1491 = vmatprep.subr.mxu1 %v3683_v39  ;;  %2003 = vmatpush3.msra.mxu0 %v1800_v13 }
 0x56d   : > { %1492 = vmatpush2.msra.mxu1 %v3684_v40  ;;  %2004 = vmatprep.subr.mxu0 %v1799_v14 }
 0x56e   : > { %1493 = vmatprep.subr.mxu1 %v3685_v42  ;;  %2005 = vmatpush3.msra.mxu0 %v1799_v14 }
 0x56f   : > { %1494 = vmatpush2.msra.mxu1 %v3686_v58  ;;  %2006 = vmatprep.subr.mxu0 %v1798_v56 }
 0x570   : > { %1495 = vmatprep.subr.mxu1 %v3687_v43  ;;  %2007 = vmatpush3.msra.mxu0 %v1798_v56 }
 0x571   : > { %1496 = vmatpush2.msra.mxu1 %v3688_v44  ;;  %2008 = vmatprep.subr.mxu0 %v1797_v54 }
 0x572   : > { %1497 = vmatprep.subr.mxu1 %v3689_v59  ;;  %2009 = vmatpush3.msra.mxu0 %v1797_v54  ;;  %v2211_v59 = vld [vmem:[#allocation5 + $0x70] ss:$8 sps:$4 sm:$0xff]  }
 0x573   : > { %1498 = vmatpush2.msra.mxu1 %v3690_v45  ;;  %1388 = vmatprep.subr.bf16.mxu0 %v2210_v52  ;;  %v3717_v45 = vmov 0  }
 0x574   : > { %1499 = vmatprep.subr.mxu1 %v3691_v48  ;;  %v2212_v48 = vld [vmem:[#allocation5 + $0x64] ss:$8 sps:$4 sm:$0xff]  }
 0x575   : > { %1500 = vmatpush2.msra.mxu1 %v3692_v49  ;;  %v2213_v49 = vld [vmem:[#allocation5 + $0x60] ss:$8 sps:$4 sm:$0xff]  }
 0x576   : > { %1501 = vmatprep.subr.mxu1 %v3693_v50  ;;  %v2214_v50 = vld [vmem:[#allocation5 + $0x54] ss:$8 sps:$4 sm:$0xff]  }
 0x577   : > { %1502 = vmatpush2.msra.mxu1 %v3694_v51  ;;  %v2215_v51 = vld [vmem:[#allocation5 + $0x50] ss:$8 sps:$4 sm:$0xff]  }
 0x578   : > { %1503 = vmatprep.subr.mxu1 %v3695_v55  ;;  %v2216_v55 = vld [vmem:[#allocation5 + $0x44] ss:$8 sps:$4 sm:$0xff]  }
 0x579   : > { %1504 = vmatpush2.msra.mxu1 %v3696_v4  ;;  %v2217_v4 = vld [vmem:[#allocation5 + $0x40] ss:$8 sps:$4 sm:$0xff]  }
 0x57a   : > { %1505 = vmatprep.subr.mxu1 %v3697_v3  ;;  %v2218_v3 = vld [vmem:[#allocation5 + $0x34] ss:$8 sps:$4 sm:$0xff]  }
 0x57b   : > { %1506 = vmatpush2.msra.mxu1 %v3698_v0  ;;  %v2219_v0 = vld [vmem:[#allocation5 + $0x30] ss:$8 sps:$4 sm:$0xff]  }
 0x57c   : > { %v1977_v17 = vpop.f32.mrf.mxu1  ;;  %1507 = vmatprep.subr.mxu1 %v3699_v1  ;;  %v2220_v1 = vld [vmem:[#allocation5 + $0x24] ss:$8 sps:$4 sm:$0xff]  }
 0x57d   : > { %v3349_v18 = vadd.f32 %v1977_v17, %v1942_v15  ;;  %1508 = vmatpush2.msra.mxu1 %v3700_v22  ;;  %v3718_v22 = vld [vmem:[#allocation15_spill] sm:$0xff] }
 0x57e   : > { %1509 = vmatprep.subr.mxu1 %v3709_v19  ;;  %v1135_v34 = vpop.f32.mrf.mxu1  ;;  %v368_v61 = vsub.s32 3, %v3718_v22 }
 0x57f   : > { %1510 = vmatpush2.msra.mxu1 %v3710_v20  ;;  %v1136_v62 = vadd.f32 %v1135_v34, %v3344_v16  ;;  %v1828_v16 = vld [vmem:[%s3520_s5 + $0x1f8] sm:$0xff] }
 0x580   : > { %1511 = vmatprep.subr.mxu1 %v3711_v21  ;;  %v369_v53 = vrot.slane %v2223_v23, %v368_v61 }
 0x581   : > { %1512 = vmatpush2.msra.mxu1 %v3712_v24 }
 0x582   : > { %1513 = vmatprep.subr.mxu1 %v3713_v25  ;;  %v501_v46 = vadd.f32 %v3719_v6, %v369_v53  ;;  %v497_v8 = vadd.f32 %v3720_v47, %v369_v53 }
 0x583   : > { %1514 = vmatpush2.msra.mxu1 %v3714_v26 }
 0x584   : > { %1515 = vmatprep.subr.mxu1 %v3715_v27  ;;  %v1387_v63 = vpack.c.bf16 %v501_v46, %v497_v8  ;;  %v3721_v8 = vld [vmem:[#allocation14_spill] sm:$0xff] }
 0x585   : > { %1516 = vmatpush2.msra.mxu1 %v3716_v28 }
 0x606   : > { %v1276_v35 = vpop.f32.mrf.mxu1 }
 0x608   : > { %v1278_v37 = vpop.f32.mrf.mxu1 }
 0x609   : > { %v1287_v36 = vmax.f32 %v1278_v37, 1e-30 }
 0x60a   : > { %v1282_v38 = vpop.f32.mrf.mxu1 }
 0x60b   : > { %2187 = vrcp.f32 %v1287_v36 }
 0x60c   : > { %v1284_v39 = vpop.f32.mrf.mxu1 }
 0x60d   : > { %v1288_v40 = vmax.f32 %v1284_v39, 1e-30  ;;  %v1824_v39 = vld [vmem:[%s3520_s5 + $0x1d8] sm:$0xff] }
 0x60f   : > { %2189 = vrcp.f32 %v1288_v40  ;;  %v1823_v40 = vld [vmem:[%s3520_s5 + $0x1d0] sm:$0xff] }
 0x618   : > { %v2188_v42 = vpop.eup %2187 }
 0x619   : > { %v1291_v58 = vmul.f32 %v2188_v42, %v1276_v35  ;;  %v1822_v42 = vld [vmem:[%s3520_s5 + $0x1c8] sm:$0xff] }
 0x61b   : > { %2010 = vmatprep.mubr.f32.mxu0 %v1291_v58  ;;  %v1821_v58 = vld [vmem:[%s3520_s5 + $0x1c0] sm:$0xff] }
 0x61c   : > { %v2190_v43 = vpop.eup %2189 }
 0x61d   : > { %v1292_v44 = vmul.f32 %v2190_v43, %v1282_v38  ;;  %v1820_v43 = vld [vmem:[%s3520_s5 + $0x1b8] sm:$0xff] }
 0x61f   : > { %2011 = vmatmul.mubr.f32.vlgmr.msra.gmra.mxu0 %v1292_v44  ;;  %v1819_v44 = vld [vmem:[%s3520_s5 + $0x1b0] sm:$0xff] }
 0x620   : > { %1389 = vmatpush1.bf16.msra.mxu0 %v2211_v59  ;;  %1420 = vmatprep.mubr.bf16.mxu0 %v3717_v45  ;;  %v1818_v59 = vld [vmem:[%s3520_s5 + $0x1a8] sm:$0xff]  ;;  %v1817_v45 = vld [vmem:[%s3520_s5 + $0x1a0] sm:$0xff] }
 0x621   : > { %1390 = vmatprep.subr.bf16.mxu0 %v2212_v48  ;;  %v1816_v48 = vld [vmem:[%s3520_s5 + $0x198] sm:$0xff] }
 0x624   : > { %1391 = vmatpush1.bf16.msra.mxu0 %v2213_v49  ;;  %v1815_v49 = vld [vmem:[%s3520_s5 + $0x190] sm:$0xff] }
 0x625   : > { %1392 = vmatprep.subr.bf16.mxu0 %v2214_v50  ;;  %v1814_v50 = vld [vmem:[%s3520_s5 + $0x188] sm:$0xff] }
 0x628   : > { %1393 = vmatpush1.bf16.msra.mxu0 %v2215_v51  ;;  %v1813_v51 = vld [vmem:[%s3520_s5 + $0x180] sm:$0xff] }
 0x629   : > { %1394 = vmatprep.subr.bf16.mxu0 %v2216_v55 }
 0x62c   : > { %1395 = vmatpush1.bf16.msra.mxu0 %v2217_v4 }
 0x62d   : > { %1396 = vmatprep.subr.bf16.mxu0 %v2218_v3 }
 0x630   : > { %1397 = vmatpush1.bf16.msra.mxu0 %v2219_v0 }
 0x631   : > { %1398 = vmatprep.subr.bf16.mxu0 %v2220_v1 }
 0x634   : > { %1399 = vmatpush1.bf16.msra.mxu0 %v2221_v31 }
 0x635   : > { %1400 = vmatprep.subr.bf16.mxu0 %v2222_v33 }
 0x638   : > { %1401 = vmatpush1.bf16.msra.mxu0 %v2224_v57  ;;  %v1829_v57 = vld [vmem:[%s3521_s6] ss:$0 sm:$0xff] }
 0x639   : > { %1402 = vmatprep.subr.bf16.mxu0 %v2225_v41 }
 0x63c   : > { %1403 = vmatpush1.bf16.msra.mxu0 %v2226_v2 }
 0x63d   : > { %2013 = vmatprep.subr.mxu0 %v1828_v16 }
 0x63f   : > { %1421 = vmatmul.mubr.bf16.vlgmr.msra.gmra.mxu0 %v1387_v63 }
 0x640   : > { %2014 = vmatpush3.msra.mxu0 %v1828_v16 }
 0x6df   : > { %v2012_v5 = vpop.f32.mrf.mxu0 }
 0x6e0   : > { %v3405_v60 = vadd.f32 %v2012_v5, %v3349_v18  ;;  %v1827_v18 = vld [vmem:[%s3520_s5 + $0x1f0] sm:$0xff]  ;;  %v3722_v5 = vld [vmem:[#allocation12_spill] sm:$0xff] }
 0x6e1   : > { %v1376_v15 = vpop.f32.mrf.mxu0  ;;  %2015 = vmatprep.subr.mxu0 %v1827_v18 }
 0x6e2   : > { %v3407_v17 = vadd.f32 %v1376_v15, %v1136_v62  ;;  %2016 = vmatpush3.msra.mxu0 %v1827_v18  ;;  %v3723_v15 = vld [vmem:[#allocation13_spill] sm:$0xff] }
 0x6e3   : > { %2017 = vmatprep.subr.mxu0 %v1826_v32 }
 0x6e4   : > { %2018 = vmatpush3.msra.mxu0 %v1826_v32 }
 0x6e5   : > { %2019 = vmatprep.subr.mxu0 %v1825_v7 }
 0x6e6   : > { %2020 = vmatpush3.msra.mxu0 %v1825_v7 }
 0x6e7   : > { %2021 = vmatprep.subr.mxu0 %v1824_v39 }
 0x6e8   : > { %2022 = vmatpush3.msra.mxu0 %v1824_v39 }
 0x6e9   : > { %2023 = vmatprep.subr.mxu0 %v1823_v40 }
 0x6ea   : > { %2024 = vmatpush3.msra.mxu0 %v1823_v40 }
 0x6eb   : > { %2025 = vmatprep.subr.mxu0 %v1822_v42 }
 0x6ec   : > { %2026 = vmatpush3.msra.mxu0 %v1822_v42 }
 0x6ed   : > { %2027 = vmatprep.subr.mxu0 %v1821_v58 }
 0x6ee   : > { %2028 = vmatpush3.msra.mxu0 %v1821_v58 }
 0x6ef   : > { %2029 = vmatprep.subr.mxu0 %v1820_v43 }
 0x6f0   : > { %2030 = vmatpush3.msra.mxu0 %v1820_v43 }
 0x6f1   : > { %2031 = vmatprep.subr.mxu0 %v1819_v44 }
 0x6f2   : > { %2032 = vmatpush3.msra.mxu0 %v1819_v44 }
 0x6f3   : > { %2033 = vmatprep.subr.mxu0 %v1818_v59 }
 0x6f4   : > { %2034 = vmatpush3.msra.mxu0 %v1818_v59 }
 0x6f5   : > { %2035 = vmatprep.subr.mxu0 %v1817_v45 }
 0x6f6   : > { %2036 = vmatpush3.msra.mxu0 %v1817_v45 }
 0x6f7   : > { %2037 = vmatprep.subr.mxu0 %v1816_v48 }
 0x6f8   : > { %2038 = vmatpush3.msra.mxu0 %v1816_v48 }
 0x6f9   : > { %2039 = vmatprep.subr.mxu0 %v1815_v49 }
 0x6fa   : > { %2040 = vmatpush3.msra.mxu0 %v1815_v49 }
 0x6fb   : > { %2041 = vmatprep.subr.mxu0 %v1814_v50 }
 0x6fc   : > { %2042 = vmatpush3.msra.mxu0 %v1814_v50 }
 0x6fd   : > { %2043 = vmatprep.subr.mxu0 %v1813_v51 }
 0x6fe   : > { %2044 = vmatpush3.msra.mxu0 %v1813_v51 }
 0x6ff   : > { %v1422_v19 = vpop.f32.mrf.mxu0 }
 0x700   : > { %v1431_v21 = vmul.f32 0.17677669, %v1422_v19 }
 0x701   : > { %v1424_v20 = vpop.f32.mrf.mxu0 }
 0x702   : > { %v1432_v24 = vmul.f32 0.17677669, %v1424_v20 }
 0x703   : > { %v1426_v25 = vpop.f32.mrf.mxu0 }
 0x704   : > { %v1435_v26 = vmax.f32 %v1431_v21, %v1432_v24  ;;  %v1433_v28 = vmul.f32 0.17677669, %v1426_v25 }
 0x705   : > { %v1428_v27 = vpop.f32.mrf.mxu0 }
 0x706   : > { %v1434_v29 = vmul.f32 0.17677669, %v1428_v27  ;;  %1436 = vmax.xlane.f32.xlu0 %v1435_v26 }
 0x708   : > { %v1438_v30 = vmax.f32 %v1433_v28, %v1434_v29 }
 0x70a   : > { %1439 = vmax.xlane.f32.xlu1 %v1438_v30 }
 0x78f   : > { %v1437_v9 = vpop.xlane.xlu0 %1436 }
 0x790   : > { %v1441_v10 = vsub.f32 %v1431_v21, %v1437_v9  ;;  %v1442_v11 = vsub.f32 %v1432_v24, %v1437_v9 }
 0x792   : > { %v1445_v12 = vmul.f32 1.442695, %v1441_v10  ;;  %v1447_v13 = vmul.f32 1.442695, %v1442_v11 }
 0x793   : > { %v1440_v14 = vpop.xlane.xlu1 %1439 }
 0x794   : > { %2191 = vpow2.f32 %v1445_v12  ;;  %v1443_v56 = vsub.f32 %v1433_v28, %v1440_v14  ;;  %v1444_v54 = vsub.f32 %v1434_v29, %v1440_v14 }
 0x795   : > { %2193 = vpow2.f32 %v1447_v13 }
 0x796   : > { %v1449_v52 = vmul.f32 1.442695, %v1443_v56  ;;  %v1451_v34 = vmul.f32 1.442695, %v1444_v54 }
 0x798   : > { %2195 = vpow2.f32 %v1449_v52 }
 0x799   : > { %2197 = vpow2.f32 %v1451_v34 }
 0x7a1   : > { %v2192_v35 = vpop.eup %2191 }
 0x7a2   : > { %v2194_v37 = vpop.eup %2193 }
 0x7a3   : > { %1517 = vmatprep.mubr.f32.mxu1 %v2194_v37 }
 0x7a4   : > { %1518 = vmatmul.mubr.f32.vlgmr.msra.gmra.mxu1 %v2192_v35 }
 0x7a5   : > { %v2196_v36 = vpop.eup %2195 }
 0x7a6   : > { %v2198_v38 = vpop.eup %2197 }
 0x7a7   : > { %1523 = vmatprep.mubr.f32.mxu1 %v2198_v38 }
 0x7a8   : > { %1524 = vmatmul.mubr.f32.gmra.mxu1 %v2196_v36 }
 0x864   : > { %v1519_v55 = vpop.f32.mrf.mxu1 }
 0x866   : > { %v1521_v4 = vpop.f32.mrf.mxu1 }
 0x867   : > { %v1530_v3 = vmax.f32 %v1521_v4, 1e-30 }
 0x868   : > { %v1525_v0 = vpop.f32.mrf.mxu1 }
 0x869   : > { %2199 = vrcp.f32 %v1530_v3 }
 0x86a   : > { %v1527_v1 = vpop.f32.mrf.mxu1 }
 0x86b   : > { %v1531_v22 = vmax.f32 %v1527_v1, 1e-30 }
 0x86d   : > { %2201 = vrcp.f32 %v1531_v22 }
 0x876   : > { %v2200_v61 = vpop.eup %2199 }
 0x877   : > { %v1534_v31 = vmul.f32 %v2200_v61, %v1519_v55 }
 0x879   : > { %2045 = vmatprep.mubr.f32.mxu0 %v1534_v31 }
 0x87a   : > { %v2202_v33 = vpop.eup %2201 }
 0x87b   : > { %v1535_v23 = vmul.f32 %v2202_v33, %v1525_v0 }
 0x87d   : > { %2046 = vmatmul.mubr.f32.vlgmr.msra.gmra.mxu0 %v1535_v23 }
 0x93d   : > { %v2047_v53 = vpop.f32.mrf.mxu0 }
 0x93e   : > { %v1629_v6 = vadd.f32 %v2047_v53, %v3405_v60  ;;  %v3724_v60 = vld [vmem:[#allocation11_spill] sm:$0xff] }
 0x93f   : > { %v1619_v46 = vpop.f32.mrf.mxu0 }
 0x940   : > { %v1638_v41 = vadd.f32 %v1829_v57, %v1629_v6  ;;  %v1628_v47 = vadd.f32 %v1619_v46, %v3407_v17 }
 0x942   : > { %v1640_v2 = vmul.f32 %v1638_v41, %v3721_v8  ;;  %v1637_v63 = vadd.f32 %v1829_v57, %v1628_v47 }
 0x944   : > { %v1642_v62 = vadd.f32 %v1640_v2, %v3722_v5  ;;  %v1639_v19 = vmul.f32 %v1637_v63, %v3723_v15 }
 0x946   : > { %1645 = vst.msk [vmem:[%s302_s19 + $0x8] sm:$0xff] %vm1643_vm1, %v1642_v62  ;;  %v1641_v17 = vadd.f32 %v1639_v19, %v3724_v60 }
 0x948   : > { %1644 = vst.msk [vmem:[%s302_s19] sm:$0xff] %vm1643_vm1, %v1641_v17 }
 0x949   : > { %2292 = shalt.err (!%p2289_p3)
}
 0x94a   : > { %s2293_s17 = scalar_lea.hbm %s3470_s23, 256  ;;  %s2297_s13 = scalar_lea.hbm %s3522_s7, 512 }
 0x94b   : > { %p2294_p2 = scmp.ne.s32.totalorder %s3470_s23, %s2293_s17  ;;  %p2298_p6 = scmp.lt.s32.totalorder %s3470_s23, %s3522_s7 }
 0x94c   : > { %p2299_p9 = scmp.lt.s32.totalorder %s2297_s13, %s2293_s17 }
 0x94d   : > { %p2295_p4 = pnand %p2294_p2, %p2437_p5 }
 0x94e   : > { %p2300_p7 = por %p2299_p9, %p2298_p6 }
 0x94f   : > { %p2296_p13 = pneg %p2295_p4 }
 0x951   : > { %p2301_p10 = pnand %p2300_p7, %p2296_p13 }
 0x953   : > { %2304 = shalt.err (!%p2301_p10)
}
 0x954   : > { %s2357_s21 = smov 128   ;;  %s2358_s22 = smov 8  }
 0x955   : > { %2056 = dma.vmem_to_hbm [thread:$0]  (%p2437_p5), %s3472_s20, 256, %s3470_s23, %s3475_s28, %s2357_s21, %s2357_s21, %s2358_s22  }
 0x956 PF: > { %p2073_p12 = scmp.ge.s32.totalorder %s2347_s27, 2  ;;  %s1675_s29 = sand.u32 1, %s2335_s24  }
 0x957   : > { %p3725_p8 = scmp.ne.s32.totalorder %s3612_s12, 0  ;;  %s1676_s8 = scalar_lea.sflag [#allocation4], %s1675_s29 }
 0x959   : > { %p2066_p11 = pnand %p2073_p12, %p3725_p8 }
 0x95b   : > { %p2067_p0 = pneg %p2066_p11 }
 0x95d   : > { %2330 = dma.done.wait (%p2067_p0), %s1676_s8, 256  }
 0x95e   : > { %2332 = vsyncadd (%p2067_p0), %s1676_s8, 4294967040  ;;  %p19_p1 = scmp.ge.s32.totalorder %s2424_s30, 4   ;;  %s3726_s24 = smov %s2339_s25 }
 0x95f   : > { %s3727_s25 = smov %s2343_s26  ;;  %s3728_s26 = smov %s2435_s10 }
 0x960   : > { %s3729_s27 = smov %s2424_s30  ;;  %21 = sbr.rel (!%p19_p1) target bundleno = 5 (0x5), region = 95 }
 0x965   :  { %1681 = vsyncpa [#allocation3], 1 }
 0x966   :  { %1683 = vsyncpa [#allocation3 + $0x1], 1 }
 0x967   :  { %1684 = vsyncpa [#allocation6], 1 }
 0x968   :  { %1685 = vsyncpa [#allocation4], 1 }
 0x969   :  { %1687 = vsyncpa [#allocation4 + $0x1], 1 }

</bundles_post_ra>
